<compile_context>
chip_gen: v5e
topology: v5e:2x2
jax: 0.10.0
libtpu: 0.0.40
codegen_flags: <defaults>
</compile_context>

<pallas_src>
import math

import jax
import jax.numpy as jnp
from jax.experimental import pallas as pl
from jax.experimental.pallas import tpu as pltpu

# ----------------------- small synthetic model config -----------------------
VOCAB = 100
TYPE_VOCAB = 2
MAX_POS = 16
HIDDEN = 32
N_LAYERS = 2
N_HEADS = 4
HEAD_DIM = HIDDEN // N_HEADS
INTER = 64
NUM_LABELS = 1          # ms-marco cross-encoder emits one relevance logit
OUT_PAD = 128           # lane-dense padded width of the logits output
LN_EPS = 1e-12
NEG_INF = -1e9


# ------------------------------ fused kernel --------------------------------
def _make_kernel(seq_len: int):
    S = seq_len
    scale = 1.0 / math.sqrt(HEAD_DIM)

    def kernel(emb_ref, keep_ref,
               emb_ln_g_ref, emb_ln_b_ref,
               qkv_w_ref, qkv_b_ref, o_w_ref, o_b_ref,
               ln1_g_ref, ln1_b_ref, f1_w_ref, f1_b_ref, f2_w_ref, f2_b_ref,
               ln2_g_ref, ln2_b_ref, pool_w_ref, pool_b_ref,
               cls_w_ref, cls_b_ref, out_ref):
        """One sequence (grid step) of the CrossEncoder forward, all in VMEM."""

        def layer_norm(x, g, b):
            mu = jnp.mean(x, axis=-1, keepdims=True)
            var = jnp.mean(jnp.square(x - mu), axis=-1, keepdims=True)
            return (x - mu) * jax.lax.rsqrt(var + LN_EPS) * g + b

        def gelu(y):
            # TODO(synk): HF MiniLM uses exact erf-GELU; tanh approximation kept
            # for guaranteed Mosaic lowering.
            return 0.5 * y * (1.0 + jnp.tanh(
                0.7978845608028654 * (y + 0.044715 * y * y * y)))

        # Additive key-padding mask built in-kernel (f32, added before the
        # max-subtraction so masking fidelity is preserved).
        bias = jnp.where(keep_ref[0] > 0.5, 0.0, NEG_INF)           # [1, S]

        x = layer_norm(emb_ref[0], emb_ln_g_ref[...], emb_ln_b_ref[...])  # [S,H] f32

        for l in range(N_LAYERS):                                   # static unroll
            # --- fused QKV projection: one lane-dense [H, 3H] matmul ---
            x16 = x.astype(jnp.bfloat16)
            qkv = jnp.dot(x16, qkv_w_ref[l],
                          preferred_element_type=jnp.float32) + qkv_b_ref[l]  # [S,3H]

            ctx_heads = []
            for h in range(N_HEADS):                                # static unroll
                q = qkv[:, h * HEAD_DIM:(h + 1) * HEAD_DIM]
                k = qkv[:, HIDDEN + h * HEAD_DIM:HIDDEN + (h + 1) * HEAD_DIM]
                v = qkv[:, 2 * HIDDEN + h * HEAD_DIM:2 * HIDDEN + (h + 1) * HEAD_DIM]
                s = jax.lax.dot_general(
                    q.astype(jnp.bfloat16), k.astype(jnp.bfloat16),
                    (((1,), (1,)), ((), ())),
                    preferred_element_type=jnp.float32) * scale + bias      # [S,S] f32
                s = s - jnp.max(s, axis=-1, keepdims=True)
                p = jnp.exp(s)
                p = p * pl.reciprocal(jnp.sum(p, axis=-1, keepdims=True),
                                      approx=True)
                ctx_heads.append(jnp.dot(p.astype(jnp.bfloat16),
                                         v.astype(jnp.bfloat16),
                                         preferred_element_type=jnp.float32))  # [S,Dh]

            # --- fused output projection: concat heads on lanes, one matmul ---
            ctx = jnp.concatenate(ctx_heads, axis=-1)                # [S, H]
            attn = jnp.dot(ctx.astype(jnp.bfloat16), o_w_ref[l],
                           preferred_element_type=jnp.float32) + o_b_ref[l]
            x = layer_norm(attn + x, ln1_g_ref[l], ln1_b_ref[l])

            # --- feed-forward (bf16 MXU, f32 elementwise) ---
            hdn = jnp.dot(x.astype(jnp.bfloat16), f1_w_ref[l],
                          preferred_element_type=jnp.float32) + f1_b_ref[l]
            hdn = gelu(hdn)
            ffn = jnp.dot(hdn.astype(jnp.bfloat16), f2_w_ref[l],
                          preferred_element_type=jnp.float32) + f2_b_ref[l]
            x = layer_norm(ffn + x, ln2_g_ref[l], ln2_b_ref[l])

        # Pooler(tanh) + classifier on the CLS row only; classifier weight is
        # zero-padded to 128 lanes -> lane-dense store of a single [1,128] row.
        cls = x[0:1, :]
        pooled = jnp.tanh(jnp.dot(cls.astype(jnp.bfloat16), pool_w_ref[...],
                                  preferred_element_type=jnp.float32)
                          + pool_b_ref[...])
        logits = jnp.dot(pooled.astype(jnp.bfloat16), cls_w_ref[...],
                         preferred_element_type=jnp.float32) + cls_b_ref[...]
        out_ref[0] = logits

    return kernel


# --------------------------- parameter construction -------------------------
def init_params(key):
    keys = iter(jax.random.split(key, 8 + N_LAYERS * 6))

    def nrm(shape):
        return 0.02 * jax.random.normal(next(keys), shape, dtype=jnp.float32)

    def zeros(shape):
        return jnp.zeros(shape, jnp.float32)

    def ones(shape):
        return jnp.ones(shape, jnp.float32)

    def bf(a):
        return a.astype(jnp.bfloat16)

    word_emb = nrm((VOCAB, HIDDEN))
    pos_emb = nrm((MAX_POS, HIDDEN))
    type_emb = nrm((TYPE_VOCAB, HIDDEN))

    qkv_w, o_w, f1_w, f2_w = [], [], [], []
    for _ in range(N_LAYERS):
        qw, kw, vw = nrm((HIDDEN, HIDDEN)), nrm((HIDDEN, HIDDEN)), nrm((HIDDEN, HIDDEN))
        qkv_w.append(jnp.concatenate([qw, kw, vw], axis=1))   # [H, 3H] lane-dense
        o_w.append(nrm((HIDDEN, HIDDEN)))                     # [H, H]  lane-dense
        f1_w.append(nrm((HIDDEN, INTER)))
        f2_w.append(nrm((INTER, HIDDEN)))

    pool_w = nrm((HIDDEN, HIDDEN))
    cls_w = nrm((HIDDEN, NUM_LABELS))
    cls_w_pad = zeros((HIDDEN, OUT_PAD)).at[:, :NUM_LABELS].set(cls_w)

    return {
        "word_emb": word_emb, "pos_emb": pos_emb, "type_emb": type_emb,
        "emb_ln_g": ones((1, HIDDEN)), "emb_ln_b": zeros((1, HIDDEN)),
        "qkv_w": bf(jnp.stack(qkv_w)),                         # [L, H, 3H] bf16
        "qkv_b": zeros((N_LAYERS, 1, 3 * HIDDEN)),             # [L, 1, 3H] f32
        "o_w": bf(jnp.stack(o_w)),                             # [L, H, H]  bf16
        "o_b": zeros((N_LAYERS, 1, HIDDEN)),
        "ln1_g": ones((N_LAYERS, 1, HIDDEN)), "ln1_b": zeros((N_LAYERS, 1, HIDDEN)),
        "f1_w": bf(jnp.stack(f1_w)), "f1_b": zeros((N_LAYERS, 1, INTER)),
        "f2_w": bf(jnp.stack(f2_w)), "f2_b": zeros((N_LAYERS, 1, HIDDEN)),
        "ln2_g": ones((N_LAYERS, 1, HIDDEN)), "ln2_b": zeros((N_LAYERS, 1, HIDDEN)),
        "pool_w": bf(pool_w), "pool_b": zeros((1, HIDDEN)),
        "cls_w_pad": bf(cls_w_pad), "cls_b_pad": zeros((1, OUT_PAD)),
    }


# -------------------------------- forward pass ------------------------------
def cross_encoder_forward(params, input_ids, token_type_ids, attention_mask):
    """Returns relevance logits [B, NUM_LABELS] (== outputs.logits)."""
    B, S = input_ids.shape
    positions = jnp.arange(S, dtype=jnp.int32)

    # Embedding gathers are plain-JAX glue; everything after runs in the kernel.
    emb = (jnp.take(params["word_emb"], input_ids, axis=0)
           + jnp.take(params["pos_emb"], positions, axis=0)[None, :, :]
           + jnp.take(params["type_emb"], token_type_ids, axis=0)
           ).astype(jnp.float32)                                  # [B, S, H]
    keep = attention_mask.astype(jnp.float32).reshape(B, 1, S)    # key-keep vector

    weight_names = ["emb_ln_g", "emb_ln_b", "qkv_w", "qkv_b", "o_w", "o_b",
                    "ln1_g", "ln1_b", "f1_w", "f1_b", "f2_w", "f2_b",
                    "ln2_g", "ln2_b", "pool_w", "pool_b", "cls_w_pad", "cls_b_pad"]
    weights = [params[n] for n in weight_names]

    def full_spec(a):
        nd = a.ndim
        # Full-array block, constant index -> stays resident across grid steps.
        return pl.BlockSpec(tuple(a.shape), lambda b, _nd=nd: (0,) * _nd)

    in_specs = ([pl.BlockSpec((1, S, HIDDEN), lambda b: (b, 0, 0)),
                 pl.BlockSpec((1, 1, S), lambda b: (b, 0, 0))]
                + [full_spec(w) for w in weights])

    # Advisory cost estimate (rough).
    flops = B * (N_LAYERS * (2 * S * HIDDEN * 3 * HIDDEN
                             + 4 * S * S * HIDDEN
                             + 2 * S * HIDDEN * HIDDEN
                             + 4 * S * HIDDEN * INTER)
                 + 2 * HIDDEN * HIDDEN + 2 * HIDDEN * OUT_PAD)
    transcendentals = B * (N_LAYERS * (N_HEADS * S * S + S * INTER) + HIDDEN)
    bytes_accessed = int(emb.size * emb.dtype.itemsize
                         + keep.size * keep.dtype.itemsize
                         + sum(w.size * w.dtype.itemsize for w in weights)
                         + B * OUT_PAD * 4)

    out = pl.pallas_call(
        _make_kernel(S),
        out_shape=jax.ShapeDtypeStruct((B, 1, OUT_PAD), jnp.float32),
        grid=(B,),
        in_specs=in_specs,
        out_specs=pl.BlockSpec((1, 1, OUT_PAD), lambda b: (b, 0, 0)),
        compiler_params=pltpu.CompilerParams(
            dimension_semantics=("parallel",),        # shard batches over TCs (v7x)
            vmem_limit_bytes=32 * 1024 * 1024),
        cost_estimate=pl.CostEstimate(flops=flops,
                                      transcendentals=transcendentals,
                                      bytes_accessed=bytes_accessed),
    )(emb, keep, *weights)

    # Real logit column(s) of the lane-padded per-sequence output row.
    return out.reshape(B, OUT_PAD)[:, :NUM_LABELS]
    # TODO(synk): pretrained-checkpoint weight loading / tokenization has no
    # Pallas equivalent; synthetic deterministic weights are used instead.
    # TODO(synk): at real MiniLM sizes, stream per-layer weight slabs from HBM
    # (pltpu.emit_pipeline) and tile attention flash-style over key blocks
    # instead of keeping everything VMEM-resident (v7x VMEM is 64 MiB).


# ------------------------------------ main -----------------------------------
if __name__ == "__main__":
    key = jax.random.PRNGKey(0)
    pkey, dkey = jax.random.split(key)
    params = init_params(pkey)

    B, S = 2, 8
    input_ids = jax.random.randint(dkey, (B, S), 0, VOCAB, dtype=jnp.int32)
    token_type_ids = jnp.concatenate(
        [jnp.zeros((B, S // 2), jnp.int32), jnp.ones((B, S // 2), jnp.int32)], axis=1)
    attention_mask = jnp.ones((B, S), jnp.int32).at[1, S - 2:].set(0)  # pad 2 tokens

    scores = jax.jit(cross_encoder_forward)(
        params, input_ids, token_type_ids, attention_mask)
    scores = jax.block_until_ready(scores)
    assert scores.shape == (B, NUM_LABELS) and scores.dtype == jnp.float32
    print("KERNEL_OK")
</pallas_src>

<mosaic_0001>
module attributes {stable_mosaic.version = 11 : i64} {
  func.func @kernel(%arg0: i32, %arg1: memref<1x8x32xf32, #tpu.memory_space<vmem>>, %arg2: memref<1x1x8xf32, #tpu.memory_space<vmem>>, %arg3: memref<1x32xf32, #tpu.memory_space<vmem>>, %arg4: memref<1x32xf32, #tpu.memory_space<vmem>>, %arg5: memref<2x32x96xbf16, #tpu.memory_space<vmem>>, %arg6: memref<2x1x96xf32, #tpu.memory_space<vmem>>, %arg7: memref<2x32x32xbf16, #tpu.memory_space<vmem>>, %arg8: memref<2x1x32xf32, #tpu.memory_space<vmem>>, %arg9: memref<2x1x32xf32, #tpu.memory_space<vmem>>, %arg10: memref<2x1x32xf32, #tpu.memory_space<vmem>>, %arg11: memref<2x32x64xbf16, #tpu.memory_space<vmem>>, %arg12: memref<2x1x64xf32, #tpu.memory_space<vmem>>, %arg13: memref<2x64x32xbf16, #tpu.memory_space<vmem>>, %arg14: memref<2x1x32xf32, #tpu.memory_space<vmem>>, %arg15: memref<2x1x32xf32, #tpu.memory_space<vmem>>, %arg16: memref<2x1x32xf32, #tpu.memory_space<vmem>>, %arg17: memref<32x32xbf16, #tpu.memory_space<vmem>>, %arg18: memref<1x32xf32, #tpu.memory_space<vmem>>, %arg19: memref<32x128xbf16, #tpu.memory_space<vmem>>, %arg20: memref<1x128xf32, #tpu.memory_space<vmem>>, %arg21: memref<1x1x128xf32, #tpu.memory_space<vmem>>) attributes {dimension_semantics = [#tpu.dimension_semantics<parallel>], iteration_bounds = array<i64: 2>, scalar_prefetch = 0 : i64, scratch_operands = 0 : i64, tpu.core_type = #tpu.core_type<tc>, window_params = [{transform_indices = @transform_0, window_bounds = array<i64: 1, 8, 32>}, {transform_indices = @transform_1, window_bounds = array<i64: 1, 1, 8>}, {pipeline_mode = #tpu.pipeline_mode<synchronous>, transform_indices = @transform_2, window_bounds = array<i64: 1, 32>}, {pipeline_mode = #tpu.pipeline_mode<synchronous>, transform_indices = @transform_3, window_bounds = array<i64: 1, 32>}, {pipeline_mode = #tpu.pipeline_mode<synchronous>, transform_indices = @transform_4, window_bounds = array<i64: 2, 32, 96>}, {pipeline_mode = #tpu.pipeline_mode<synchronous>, transform_indices = @transform_5, window_bounds = array<i64: 2, 1, 96>}, {pipeline_mode = #tpu.pipeline_mode<synchronous>, transform_indices = @transform_6, window_bounds = array<i64: 2, 32, 32>}, {pipeline_mode = #tpu.pipeline_mode<synchronous>, transform_indices = @transform_7, window_bounds = array<i64: 2, 1, 32>}, {pipeline_mode = #tpu.pipeline_mode<synchronous>, transform_indices = @transform_8, window_bounds = array<i64: 2, 1, 32>}, {pipeline_mode = #tpu.pipeline_mode<synchronous>, transform_indices = @transform_9, window_bounds = array<i64: 2, 1, 32>}, {pipeline_mode = #tpu.pipeline_mode<synchronous>, transform_indices = @transform_10, window_bounds = array<i64: 2, 32, 64>}, {pipeline_mode = #tpu.pipeline_mode<synchronous>, transform_indices = @transform_11, window_bounds = array<i64: 2, 1, 64>}, {pipeline_mode = #tpu.pipeline_mode<synchronous>, transform_indices = @transform_12, window_bounds = array<i64: 2, 64, 32>}, {pipeline_mode = #tpu.pipeline_mode<synchronous>, transform_indices = @transform_13, window_bounds = array<i64: 2, 1, 32>}, {pipeline_mode = #tpu.pipeline_mode<synchronous>, transform_indices = @transform_14, window_bounds = array<i64: 2, 1, 32>}, {pipeline_mode = #tpu.pipeline_mode<synchronous>, transform_indices = @transform_15, window_bounds = array<i64: 2, 1, 32>}, {pipeline_mode = #tpu.pipeline_mode<synchronous>, transform_indices = @transform_16, window_bounds = array<i64: 32, 32>}, {pipeline_mode = #tpu.pipeline_mode<synchronous>, transform_indices = @transform_17, window_bounds = array<i64: 1, 32>}, {pipeline_mode = #tpu.pipeline_mode<synchronous>, transform_indices = @transform_18, window_bounds = array<i64: 32, 128>}, {pipeline_mode = #tpu.pipeline_mode<synchronous>, transform_indices = @transform_19, window_bounds = array<i64: 1, 128>}, {transform_indices = @transform_20, window_bounds = array<i64: 1, 1, 128>}]} {
    %c0 = arith.constant 0 : index
    %c0_0 = arith.constant 0 : index
    %c0_1 = arith.constant 0 : index
    %0 = vector.load %arg2[%c0, %c0_0, %c0_1] : memref<1x1x8xf32, #tpu.memory_space<vmem>>, vector<1x1x8xf32>
    %1 = vector.shape_cast %0 : vector<1x1x8xf32> to vector<1x8xf32>
    %cst = arith.constant 5.000000e-01 : f32
    %2 = vector.broadcast %cst : f32 to vector<1x8xf32>
    %3 = arith.cmpf ogt, %1, %2 : vector<1x8xf32>
    %cst_2 = arith.constant 0.000000e+00 : f32
    %cst_3 = arith.constant -1.000000e+09 : f32
    %4 = vector.broadcast %cst_2 : f32 to vector<1x8xf32>
    %5 = vector.broadcast %cst_3 : f32 to vector<1x8xf32>
    %6 = arith.select %3, %4, %5 : vector<1x8xi1>, vector<1x8xf32>
    %c0_4 = arith.constant 0 : index
    %c0_5 = arith.constant 0 : index
    %c0_6 = arith.constant 0 : index
    %7 = vector.load %arg1[%c0_4, %c0_5, %c0_6] : memref<1x8x32xf32, #tpu.memory_space<vmem>>, vector<1x8x32xf32>
    %8 = vector.shape_cast %7 : vector<1x8x32xf32> to vector<8x32xf32>
    %c0_7 = arith.constant 0 : index
    %c0_8 = arith.constant 0 : index
    %9 = vector.load %arg3[%c0_7, %c0_8] : memref<1x32xf32, #tpu.memory_space<vmem>>, vector<1x32xf32>
    %c0_9 = arith.constant 0 : index
    %c0_10 = arith.constant 0 : index
    %10 = vector.load %arg4[%c0_9, %c0_10] : memref<1x32xf32, #tpu.memory_space<vmem>>, vector<1x32xf32>
    %cst_11 = arith.constant dense<0.000000e+00> : vector<8xf32>
    %11 = vector.multi_reduction <add>, %8, %cst_11 [1] : vector<8x32xf32> to vector<8xf32>
    %12 = vector.shape_cast %11 : vector<8xf32> to vector<8x1xf32>
    %cst_12 = arith.constant 3.200000e+01 : f32
    %13 = vector.broadcast %cst_12 : f32 to vector<8x1xf32>
    %14 = arith.divf %12, %13 : vector<8x1xf32>
    %15 = vector.broadcast %14 : vector<8x1xf32> to vector<8x32xf32>
    %16 = arith.subf %8, %15 : vector<8x32xf32>
    %17 = arith.mulf %16, %16 : vector<8x32xf32>
    %cst_13 = arith.constant dense<0.000000e+00> : vector<8xf32>
    %18 = vector.multi_reduction <add>, %17, %cst_13 [1] : vector<8x32xf32> to vector<8xf32>
    %19 = vector.shape_cast %18 : vector<8xf32> to vector<8x1xf32>
    %cst_14 = arith.constant 3.200000e+01 : f32
    %20 = vector.broadcast %cst_14 : f32 to vector<8x1xf32>
    %21 = arith.divf %19, %20 : vector<8x1xf32>
    %22 = vector.broadcast %14 : vector<8x1xf32> to vector<8x32xf32>
    %23 = arith.subf %8, %22 : vector<8x32xf32>
    %cst_15 = arith.constant 9.99999996E-13 : f32
    %24 = vector.broadcast %cst_15 : f32 to vector<8x1xf32>
    %25 = arith.addf %21, %24 : vector<8x1xf32>
    %26 = math.rsqrt %25 : vector<8x1xf32>
    %27 = vector.broadcast %26 : vector<8x1xf32> to vector<8x32xf32>
    %28 = arith.mulf %23, %27 : vector<8x32xf32>
    %29 = vector.broadcast %9 : vector<1x32xf32> to vector<8x32xf32>
    %30 = arith.mulf %28, %29 : vector<8x32xf32>
    %31 = vector.broadcast %10 : vector<1x32xf32> to vector<8x32xf32>
    %32 = arith.addf %30, %31 : vector<8x32xf32>
    %33 = arith.truncf %32 : vector<8x32xf32> to vector<8x32xbf16>
    %c0_16 = arith.constant 0 : index
    %c0_17 = arith.constant 0 : index
    %c0_18 = arith.constant 0 : index
    %34 = vector.load %arg5[%c0_16, %c0_17, %c0_18] : memref<2x32x96xbf16, #tpu.memory_space<vmem>>, vector<1x32x96xbf16>
    %35 = vector.shape_cast %34 : vector<1x32x96xbf16> to vector<32x96xbf16>
    %cst_19 = arith.constant dense<0.000000e+00> : vector<8x96xf32>
    %36 = tpu.matmul %33, %35, %cst_19 {dimension_numbers = #tpu.dot_dimension_numbers<[1], [0], [0], [1], [0, 0, 1, 1], [], []>} : vector<8x32xbf16>, vector<32x96xbf16>, vector<8x96xf32> -> vector<8x96xf32>
    %c0_20 = arith.constant 0 : index
    %c0_21 = arith.constant 0 : index
    %c0_22 = arith.constant 0 : index
    %37 = vector.load %arg6[%c0_20, %c0_21, %c0_22] : memref<2x1x96xf32, #tpu.memory_space<vmem>>, vector<1x1x96xf32>
    %38 = vector.shape_cast %37 : vector<1x1x96xf32> to vector<1x96xf32>
    %39 = vector.broadcast %38 : vector<1x96xf32> to vector<8x96xf32>
    %40 = arith.addf %36, %39 : vector<8x96xf32>
    %41 = vector.extract_strided_slice %40 {offsets = [0, 0], sizes = [8, 8], strides = [1, 1]} : vector<8x96xf32> to vector<8x8xf32>
    %42 = vector.extract_strided_slice %40 {offsets = [0, 32], sizes = [8, 8], strides = [1, 1]} : vector<8x96xf32> to vector<8x8xf32>
    %43 = vector.extract_strided_slice %40 {offsets = [0, 64], sizes = [8, 8], strides = [1, 1]} : vector<8x96xf32> to vector<8x8xf32>
    %44 = arith.truncf %41 : vector<8x8xf32> to vector<8x8xbf16>
    %45 = arith.truncf %42 : vector<8x8xf32> to vector<8x8xbf16>
    %cst_23 = arith.constant dense<0.000000e+00> : vector<8x8xf32>
    %46 = tpu.matmul %44, %45, %cst_23 {dimension_numbers = #tpu.dot_dimension_numbers<[1], [1], [0], [0], [0, 0, 1, 0], [], []>} : vector<8x8xbf16>, vector<8x8xbf16>, vector<8x8xf32> -> vector<8x8xf32>
    %cst_24 = arith.constant 0.353553385 : f32
    %47 = vector.broadcast %cst_24 : f32 to vector<8x8xf32>
    %48 = arith.mulf %46, %47 : vector<8x8xf32>
    %49 = vector.broadcast %6 : vector<1x8xf32> to vector<8x8xf32>
    %50 = arith.addf %48, %49 : vector<8x8xf32>
    %cst_25 = arith.constant dense<0xFF800000> : vector<8xf32>
    %51 = vector.multi_reduction <maximumf>, %50, %cst_25 [1] : vector<8x8xf32> to vector<8xf32>
    %52 = vector.shape_cast %51 : vector<8xf32> to vector<8x1xf32>
    %53 = vector.broadcast %52 : vector<8x1xf32> to vector<8x8xf32>
    %54 = arith.subf %50, %53 : vector<8x8xf32>
    %55 = math.exp %54 : vector<8x8xf32>
    %cst_26 = arith.constant dense<0.000000e+00> : vector<8xf32>
    %56 = vector.multi_reduction <add>, %55, %cst_26 [1] : vector<8x8xf32> to vector<8xf32>
    %57 = vector.shape_cast %56 : vector<8xf32> to vector<8x1xf32>
    %58 = tpu.reciprocal %57 {approx = true} : vector<8x1xf32> -> vector<8x1xf32>
    %59 = vector.broadcast %58 : vector<8x1xf32> to vector<8x8xf32>
    %60 = arith.mulf %55, %59 : vector<8x8xf32>
    %61 = arith.truncf %60 : vector<8x8xf32> to vector<8x8xbf16>
    %62 = arith.truncf %43 : vector<8x8xf32> to vector<8x8xbf16>
    %cst_27 = arith.constant dense<0.000000e+00> : vector<8x8xf32>
    %63 = tpu.matmul %61, %62, %cst_27 {dimension_numbers = #tpu.dot_dimension_numbers<[1], [0], [0], [1], [0, 0, 1, 1], [], []>} : vector<8x8xbf16>, vector<8x8xbf16>, vector<8x8xf32> -> vector<8x8xf32>
    %64 = vector.extract_strided_slice %40 {offsets = [0, 8], sizes = [8, 8], strides = [1, 1]} : vector<8x96xf32> to vector<8x8xf32>
    %65 = vector.extract_strided_slice %40 {offsets = [0, 40], sizes = [8, 8], strides = [1, 1]} : vector<8x96xf32> to vector<8x8xf32>
    %66 = vector.extract_strided_slice %40 {offsets = [0, 72], sizes = [8, 8], strides = [1, 1]} : vector<8x96xf32> to vector<8x8xf32>
    %67 = arith.truncf %64 : vector<8x8xf32> to vector<8x8xbf16>
    %68 = arith.truncf %65 : vector<8x8xf32> to vector<8x8xbf16>
    %cst_28 = arith.constant dense<0.000000e+00> : vector<8x8xf32>
    %69 = tpu.matmul %67, %68, %cst_28 {dimension_numbers = #tpu.dot_dimension_numbers<[1], [1], [0], [0], [0, 0, 1, 0], [], []>} : vector<8x8xbf16>, vector<8x8xbf16>, vector<8x8xf32> -> vector<8x8xf32>
    %cst_29 = arith.constant 0.353553385 : f32
    %70 = vector.broadcast %cst_29 : f32 to vector<8x8xf32>
    %71 = arith.mulf %69, %70 : vector<8x8xf32>
    %72 = vector.broadcast %6 : vector<1x8xf32> to vector<8x8xf32>
    %73 = arith.addf %71, %72 : vector<8x8xf32>
    %cst_30 = arith.constant dense<0xFF800000> : vector<8xf32>
    %74 = vector.multi_reduction <maximumf>, %73, %cst_30 [1] : vector<8x8xf32> to vector<8xf32>
    %75 = vector.shape_cast %74 : vector<8xf32> to vector<8x1xf32>
    %76 = vector.broadcast %75 : vector<8x1xf32> to vector<8x8xf32>
    %77 = arith.subf %73, %76 : vector<8x8xf32>
    %78 = math.exp %77 : vector<8x8xf32>
    %cst_31 = arith.constant dense<0.000000e+00> : vector<8xf32>
    %79 = vector.multi_reduction <add>, %78, %cst_31 [1] : vector<8x8xf32> to vector<8xf32>
    %80 = vector.shape_cast %79 : vector<8xf32> to vector<8x1xf32>
    %81 = tpu.reciprocal %80 {approx = true} : vector<8x1xf32> -> vector<8x1xf32>
    %82 = vector.broadcast %81 : vector<8x1xf32> to vector<8x8xf32>
    %83 = arith.mulf %78, %82 : vector<8x8xf32>
    %84 = arith.truncf %83 : vector<8x8xf32> to vector<8x8xbf16>
    %85 = arith.truncf %66 : vector<8x8xf32> to vector<8x8xbf16>
    %cst_32 = arith.constant dense<0.000000e+00> : vector<8x8xf32>
    %86 = tpu.matmul %84, %85, %cst_32 {dimension_numbers = #tpu.dot_dimension_numbers<[1], [0], [0], [1], [0, 0, 1, 1], [], []>} : vector<8x8xbf16>, vector<8x8xbf16>, vector<8x8xf32> -> vector<8x8xf32>
    %87 = vector.extract_strided_slice %40 {offsets = [0, 16], sizes = [8, 8], strides = [1, 1]} : vector<8x96xf32> to vector<8x8xf32>
    %88 = vector.extract_strided_slice %40 {offsets = [0, 48], sizes = [8, 8], strides = [1, 1]} : vector<8x96xf32> to vector<8x8xf32>
    %89 = vector.extract_strided_slice %40 {offsets = [0, 80], sizes = [8, 8], strides = [1, 1]} : vector<8x96xf32> to vector<8x8xf32>
    %90 = arith.truncf %87 : vector<8x8xf32> to vector<8x8xbf16>
    %91 = arith.truncf %88 : vector<8x8xf32> to vector<8x8xbf16>
    %cst_33 = arith.constant dense<0.000000e+00> : vector<8x8xf32>
    %92 = tpu.matmul %90, %91, %cst_33 {dimension_numbers = #tpu.dot_dimension_numbers<[1], [1], [0], [0], [0, 0, 1, 0], [], []>} : vector<8x8xbf16>, vector<8x8xbf16>, vector<8x8xf32> -> vector<8x8xf32>
    %cst_34 = arith.constant 0.353553385 : f32
    %93 = vector.broadcast %cst_34 : f32 to vector<8x8xf32>
    %94 = arith.mulf %92, %93 : vector<8x8xf32>
    %95 = vector.broadcast %6 : vector<1x8xf32> to vector<8x8xf32>
    %96 = arith.addf %94, %95 : vector<8x8xf32>
    %cst_35 = arith.constant dense<0xFF800000> : vector<8xf32>
    %97 = vector.multi_reduction <maximumf>, %96, %cst_35 [1] : vector<8x8xf32> to vector<8xf32>
    %98 = vector.shape_cast %97 : vector<8xf32> to vector<8x1xf32>
    %99 = vector.broadcast %98 : vector<8x1xf32> to vector<8x8xf32>
    %100 = arith.subf %96, %99 : vector<8x8xf32>
    %101 = math.exp %100 : vector<8x8xf32>
    %cst_36 = arith.constant dense<0.000000e+00> : vector<8xf32>
    %102 = vector.multi_reduction <add>, %101, %cst_36 [1] : vector<8x8xf32> to vector<8xf32>
    %103 = vector.shape_cast %102 : vector<8xf32> to vector<8x1xf32>
    %104 = tpu.reciprocal %103 {approx = true} : vector<8x1xf32> -> vector<8x1xf32>
    %105 = vector.broadcast %104 : vector<8x1xf32> to vector<8x8xf32>
    %106 = arith.mulf %101, %105 : vector<8x8xf32>
    %107 = arith.truncf %106 : vector<8x8xf32> to vector<8x8xbf16>
    %108 = arith.truncf %89 : vector<8x8xf32> to vector<8x8xbf16>
    %cst_37 = arith.constant dense<0.000000e+00> : vector<8x8xf32>
    %109 = tpu.matmul %107, %108, %cst_37 {dimension_numbers = #tpu.dot_dimension_numbers<[1], [0], [0], [1], [0, 0, 1, 1], [], []>} : vector<8x8xbf16>, vector<8x8xbf16>, vector<8x8xf32> -> vector<8x8xf32>
    %110 = vector.extract_strided_slice %40 {offsets = [0, 24], sizes = [8, 8], strides = [1, 1]} : vector<8x96xf32> to vector<8x8xf32>
    %111 = vector.extract_strided_slice %40 {offsets = [0, 56], sizes = [8, 8], strides = [1, 1]} : vector<8x96xf32> to vector<8x8xf32>
    %112 = vector.extract_strided_slice %40 {offsets = [0, 88], sizes = [8, 8], strides = [1, 1]} : vector<8x96xf32> to vector<8x8xf32>
    %113 = arith.truncf %110 : vector<8x8xf32> to vector<8x8xbf16>
    %114 = arith.truncf %111 : vector<8x8xf32> to vector<8x8xbf16>
    %cst_38 = arith.constant dense<0.000000e+00> : vector<8x8xf32>
    %115 = tpu.matmul %113, %114, %cst_38 {dimension_numbers = #tpu.dot_dimension_numbers<[1], [1], [0], [0], [0, 0, 1, 0], [], []>} : vector<8x8xbf16>, vector<8x8xbf16>, vector<8x8xf32> -> vector<8x8xf32>
    %cst_39 = arith.constant 0.353553385 : f32
    %116 = vector.broadcast %cst_39 : f32 to vector<8x8xf32>
    %117 = arith.mulf %115, %116 : vector<8x8xf32>
    %118 = vector.broadcast %6 : vector<1x8xf32> to vector<8x8xf32>
    %119 = arith.addf %117, %118 : vector<8x8xf32>
    %cst_40 = arith.constant dense<0xFF800000> : vector<8xf32>
    %120 = vector.multi_reduction <maximumf>, %119, %cst_40 [1] : vector<8x8xf32> to vector<8xf32>
    %121 = vector.shape_cast %120 : vector<8xf32> to vector<8x1xf32>
    %122 = vector.broadcast %121 : vector<8x1xf32> to vector<8x8xf32>
    %123 = arith.subf %119, %122 : vector<8x8xf32>
    %124 = math.exp %123 : vector<8x8xf32>
    %cst_41 = arith.constant dense<0.000000e+00> : vector<8xf32>
    %125 = vector.multi_reduction <add>, %124, %cst_41 [1] : vector<8x8xf32> to vector<8xf32>
    %126 = vector.shape_cast %125 : vector<8xf32> to vector<8x1xf32>
    %127 = tpu.reciprocal %126 {approx = true} : vector<8x1xf32> -> vector<8x1xf32>
    %128 = vector.broadcast %127 : vector<8x1xf32> to vector<8x8xf32>
    %129 = arith.mulf %124, %128 : vector<8x8xf32>
    %130 = arith.truncf %129 : vector<8x8xf32> to vector<8x8xbf16>
    %131 = arith.truncf %112 : vector<8x8xf32> to vector<8x8xbf16>
    %cst_42 = arith.constant dense<0.000000e+00> : vector<8x8xf32>
    %132 = tpu.matmul %130, %131, %cst_42 {dimension_numbers = #tpu.dot_dimension_numbers<[1], [0], [0], [1], [0, 0, 1, 1], [], []>} : vector<8x8xbf16>, vector<8x8xbf16>, vector<8x8xf32> -> vector<8x8xf32>
    %133 = tpu.concatenate %63, %86, %109, %132 in 1 : vector<8x8xf32>, vector<8x8xf32>, vector<8x8xf32>, vector<8x8xf32> -> vector<8x32xf32>
    %134 = arith.truncf %133 : vector<8x32xf32> to vector<8x32xbf16>
    %c0_43 = arith.constant 0 : index
    %c0_44 = arith.constant 0 : index
    %c0_45 = arith.constant 0 : index
    %135 = vector.load %arg7[%c0_43, %c0_44, %c0_45] : memref<2x32x32xbf16, #tpu.memory_space<vmem>>, vector<1x32x32xbf16>
    %136 = vector.shape_cast %135 : vector<1x32x32xbf16> to vector<32x32xbf16>
    %cst_46 = arith.constant dense<0.000000e+00> : vector<8x32xf32>
    %137 = tpu.matmul %134, %136, %cst_46 {dimension_numbers = #tpu.dot_dimension_numbers<[1], [0], [0], [1], [0, 0, 1, 1], [], []>} : vector<8x32xbf16>, vector<32x32xbf16>, vector<8x32xf32> -> vector<8x32xf32>
    %c0_47 = arith.constant 0 : index
    %c0_48 = arith.constant 0 : index
    %c0_49 = arith.constant 0 : index
    %138 = vector.load %arg8[%c0_47, %c0_48, %c0_49] : memref<2x1x32xf32, #tpu.memory_space<vmem>>, vector<1x1x32xf32>
    %139 = vector.shape_cast %138 : vector<1x1x32xf32> to vector<1x32xf32>
    %140 = vector.broadcast %139 : vector<1x32xf32> to vector<8x32xf32>
    %141 = arith.addf %137, %140 : vector<8x32xf32>
    %142 = arith.addf %141, %32 : vector<8x32xf32>
    %c0_50 = arith.constant 0 : index
    %c0_51 = arith.constant 0 : index
    %c0_52 = arith.constant 0 : index
    %143 = vector.load %arg9[%c0_50, %c0_51, %c0_52] : memref<2x1x32xf32, #tpu.memory_space<vmem>>, vector<1x1x32xf32>
    %144 = vector.shape_cast %143 : vector<1x1x32xf32> to vector<1x32xf32>
    %c0_53 = arith.constant 0 : index
    %c0_54 = arith.constant 0 : index
    %c0_55 = arith.constant 0 : index
    %145 = vector.load %arg10[%c0_53, %c0_54, %c0_55] : memref<2x1x32xf32, #tpu.memory_space<vmem>>, vector<1x1x32xf32>
    %146 = vector.shape_cast %145 : vector<1x1x32xf32> to vector<1x32xf32>
    %cst_56 = arith.constant dense<0.000000e+00> : vector<8xf32>
    %147 = vector.multi_reduction <add>, %142, %cst_56 [1] : vector<8x32xf32> to vector<8xf32>
    %148 = vector.shape_cast %147 : vector<8xf32> to vector<8x1xf32>
    %cst_57 = arith.constant 3.200000e+01 : f32
    %149 = vector.broadcast %cst_57 : f32 to vector<8x1xf32>
    %150 = arith.divf %148, %149 : vector<8x1xf32>
    %151 = vector.broadcast %150 : vector<8x1xf32> to vector<8x32xf32>
    %152 = arith.subf %142, %151 : vector<8x32xf32>
    %153 = arith.mulf %152, %152 : vector<8x32xf32>
    %cst_58 = arith.constant dense<0.000000e+00> : vector<8xf32>
    %154 = vector.multi_reduction <add>, %153, %cst_58 [1] : vector<8x32xf32> to vector<8xf32>
    %155 = vector.shape_cast %154 : vector<8xf32> to vector<8x1xf32>
    %cst_59 = arith.constant 3.200000e+01 : f32
    %156 = vector.broadcast %cst_59 : f32 to vector<8x1xf32>
    %157 = arith.divf %155, %156 : vector<8x1xf32>
    %158 = vector.broadcast %150 : vector<8x1xf32> to vector<8x32xf32>
    %159 = arith.subf %142, %158 : vector<8x32xf32>
    %cst_60 = arith.constant 9.99999996E-13 : f32
    %160 = vector.broadcast %cst_60 : f32 to vector<8x1xf32>
    %161 = arith.addf %157, %160 : vector<8x1xf32>
    %162 = math.rsqrt %161 : vector<8x1xf32>
    %163 = vector.broadcast %162 : vector<8x1xf32> to vector<8x32xf32>
    %164 = arith.mulf %159, %163 : vector<8x32xf32>
    %165 = vector.broadcast %144 : vector<1x32xf32> to vector<8x32xf32>
    %166 = arith.mulf %164, %165 : vector<8x32xf32>
    %167 = vector.broadcast %146 : vector<1x32xf32> to vector<8x32xf32>
    %168 = arith.addf %166, %167 : vector<8x32xf32>
    %169 = arith.truncf %168 : vector<8x32xf32> to vector<8x32xbf16>
    %c0_61 = arith.constant 0 : index
    %c0_62 = arith.constant 0 : index
    %c0_63 = arith.constant 0 : index
    %170 = vector.load %arg11[%c0_61, %c0_62, %c0_63] : memref<2x32x64xbf16, #tpu.memory_space<vmem>>, vector<1x32x64xbf16>
    %171 = vector.shape_cast %170 : vector<1x32x64xbf16> to vector<32x64xbf16>
    %cst_64 = arith.constant dense<0.000000e+00> : vector<8x64xf32>
    %172 = tpu.matmul %169, %171, %cst_64 {dimension_numbers = #tpu.dot_dimension_numbers<[1], [0], [0], [1], [0, 0, 1, 1], [], []>} : vector<8x32xbf16>, vector<32x64xbf16>, vector<8x64xf32> -> vector<8x64xf32>
    %c0_65 = arith.constant 0 : index
    %c0_66 = arith.constant 0 : index
    %c0_67 = arith.constant 0 : index
    %173 = vector.load %arg12[%c0_65, %c0_66, %c0_67] : memref<2x1x64xf32, #tpu.memory_space<vmem>>, vector<1x1x64xf32>
    %174 = vector.shape_cast %173 : vector<1x1x64xf32> to vector<1x64xf32>
    %175 = vector.broadcast %174 : vector<1x64xf32> to vector<8x64xf32>
    %176 = arith.addf %172, %175 : vector<8x64xf32>
    %cst_68 = arith.constant 5.000000e-01 : f32
    %177 = vector.broadcast %cst_68 : f32 to vector<8x64xf32>
    %178 = arith.mulf %177, %176 : vector<8x64xf32>
    %cst_69 = arith.constant 4.471500e-02 : f32
    %179 = vector.broadcast %cst_69 : f32 to vector<8x64xf32>
    %180 = arith.mulf %179, %176 : vector<8x64xf32>
    %181 = arith.mulf %180, %176 : vector<8x64xf32>
    %182 = arith.mulf %181, %176 : vector<8x64xf32>
    %183 = arith.addf %176, %182 : vector<8x64xf32>
    %cst_70 = arith.constant 0.797884583 : f32
    %184 = vector.broadcast %cst_70 : f32 to vector<8x64xf32>
    %185 = arith.mulf %184, %183 : vector<8x64xf32>
    %186 = math.tanh %185 : vector<8x64xf32>
    %cst_71 = arith.constant 1.000000e+00 : f32
    %187 = vector.broadcast %cst_71 : f32 to vector<8x64xf32>
    %188 = arith.addf %187, %186 : vector<8x64xf32>
    %189 = arith.mulf %178, %188 : vector<8x64xf32>
    %190 = arith.truncf %189 : vector<8x64xf32> to vector<8x64xbf16>
    %c0_72 = arith.constant 0 : index
    %c0_73 = arith.constant 0 : index
    %c0_74 = arith.constant 0 : index
    %191 = vector.load %arg13[%c0_72, %c0_73, %c0_74] : memref<2x64x32xbf16, #tpu.memory_space<vmem>>, vector<1x64x32xbf16>
    %192 = vector.shape_cast %191 : vector<1x64x32xbf16> to vector<64x32xbf16>
    %cst_75 = arith.constant dense<0.000000e+00> : vector<8x32xf32>
    %193 = tpu.matmul %190, %192, %cst_75 {dimension_numbers = #tpu.dot_dimension_numbers<[1], [0], [0], [1], [0, 0, 1, 1], [], []>} : vector<8x64xbf16>, vector<64x32xbf16>, vector<8x32xf32> -> vector<8x32xf32>
    %c0_76 = arith.constant 0 : index
    %c0_77 = arith.constant 0 : index
    %c0_78 = arith.constant 0 : index
    %194 = vector.load %arg14[%c0_76, %c0_77, %c0_78] : memref<2x1x32xf32, #tpu.memory_space<vmem>>, vector<1x1x32xf32>
    %195 = vector.shape_cast %194 : vector<1x1x32xf32> to vector<1x32xf32>
    %196 = vector.broadcast %195 : vector<1x32xf32> to vector<8x32xf32>
    %197 = arith.addf %193, %196 : vector<8x32xf32>
    %198 = arith.addf %197, %168 : vector<8x32xf32>
    %c0_79 = arith.constant 0 : index
    %c0_80 = arith.constant 0 : index
    %c0_81 = arith.constant 0 : index
    %199 = vector.load %arg15[%c0_79, %c0_80, %c0_81] : memref<2x1x32xf32, #tpu.memory_space<vmem>>, vector<1x1x32xf32>
    %200 = vector.shape_cast %199 : vector<1x1x32xf32> to vector<1x32xf32>
    %c0_82 = arith.constant 0 : index
    %c0_83 = arith.constant 0 : index
    %c0_84 = arith.constant 0 : index
    %201 = vector.load %arg16[%c0_82, %c0_83, %c0_84] : memref<2x1x32xf32, #tpu.memory_space<vmem>>, vector<1x1x32xf32>
    %202 = vector.shape_cast %201 : vector<1x1x32xf32> to vector<1x32xf32>
    %cst_85 = arith.constant dense<0.000000e+00> : vector<8xf32>
    %203 = vector.multi_reduction <add>, %198, %cst_85 [1] : vector<8x32xf32> to vector<8xf32>
    %204 = vector.shape_cast %203 : vector<8xf32> to vector<8x1xf32>
    %cst_86 = arith.constant 3.200000e+01 : f32
    %205 = vector.broadcast %cst_86 : f32 to vector<8x1xf32>
    %206 = arith.divf %204, %205 : vector<8x1xf32>
    %207 = vector.broadcast %206 : vector<8x1xf32> to vector<8x32xf32>
    %208 = arith.subf %198, %207 : vector<8x32xf32>
    %209 = arith.mulf %208, %208 : vector<8x32xf32>
    %cst_87 = arith.constant dense<0.000000e+00> : vector<8xf32>
    %210 = vector.multi_reduction <add>, %209, %cst_87 [1] : vector<8x32xf32> to vector<8xf32>
    %211 = vector.shape_cast %210 : vector<8xf32> to vector<8x1xf32>
    %cst_88 = arith.constant 3.200000e+01 : f32
    %212 = vector.broadcast %cst_88 : f32 to vector<8x1xf32>
    %213 = arith.divf %211, %212 : vector<8x1xf32>
    %214 = vector.broadcast %206 : vector<8x1xf32> to vector<8x32xf32>
    %215 = arith.subf %198, %214 : vector<8x32xf32>
    %cst_89 = arith.constant 9.99999996E-13 : f32
    %216 = vector.broadcast %cst_89 : f32 to vector<8x1xf32>
    %217 = arith.addf %213, %216 : vector<8x1xf32>
    %218 = math.rsqrt %217 : vector<8x1xf32>
    %219 = vector.broadcast %218 : vector<8x1xf32> to vector<8x32xf32>
    %220 = arith.mulf %215, %219 : vector<8x32xf32>
    %221 = vector.broadcast %200 : vector<1x32xf32> to vector<8x32xf32>
    %222 = arith.mulf %220, %221 : vector<8x32xf32>
    %223 = vector.broadcast %202 : vector<1x32xf32> to vector<8x32xf32>
    %224 = arith.addf %222, %223 : vector<8x32xf32>
    %225 = arith.truncf %224 : vector<8x32xf32> to vector<8x32xbf16>
    %c1 = arith.constant 1 : index
    %c0_90 = arith.constant 0 : index
    %c0_91 = arith.constant 0 : index
    %226 = vector.load %arg5[%c1, %c0_90, %c0_91] : memref<2x32x96xbf16, #tpu.memory_space<vmem>>, vector<1x32x96xbf16>
    %227 = vector.shape_cast %226 : vector<1x32x96xbf16> to vector<32x96xbf16>
    %cst_92 = arith.constant dense<0.000000e+00> : vector<8x96xf32>
    %228 = tpu.matmul %225, %227, %cst_92 {dimension_numbers = #tpu.dot_dimension_numbers<[1], [0], [0], [1], [0, 0, 1, 1], [], []>} : vector<8x32xbf16>, vector<32x96xbf16>, vector<8x96xf32> -> vector<8x96xf32>
    %c1_93 = arith.constant 1 : index
    %c0_94 = arith.constant 0 : index
    %c0_95 = arith.constant 0 : index
    %229 = vector.load %arg6[%c1_93, %c0_94, %c0_95] : memref<2x1x96xf32, #tpu.memory_space<vmem>>, vector<1x1x96xf32>
    %230 = vector.shape_cast %229 : vector<1x1x96xf32> to vector<1x96xf32>
    %231 = vector.broadcast %230 : vector<1x96xf32> to vector<8x96xf32>
    %232 = arith.addf %228, %231 : vector<8x96xf32>
    %233 = vector.extract_strided_slice %232 {offsets = [0, 0], sizes = [8, 8], strides = [1, 1]} : vector<8x96xf32> to vector<8x8xf32>
    %234 = vector.extract_strided_slice %232 {offsets = [0, 32], sizes = [8, 8], strides = [1, 1]} : vector<8x96xf32> to vector<8x8xf32>
    %235 = vector.extract_strided_slice %232 {offsets = [0, 64], sizes = [8, 8], strides = [1, 1]} : vector<8x96xf32> to vector<8x8xf32>
    %236 = arith.truncf %233 : vector<8x8xf32> to vector<8x8xbf16>
    %237 = arith.truncf %234 : vector<8x8xf32> to vector<8x8xbf16>
    %cst_96 = arith.constant dense<0.000000e+00> : vector<8x8xf32>
    %238 = tpu.matmul %236, %237, %cst_96 {dimension_numbers = #tpu.dot_dimension_numbers<[1], [1], [0], [0], [0, 0, 1, 0], [], []>} : vector<8x8xbf16>, vector<8x8xbf16>, vector<8x8xf32> -> vector<8x8xf32>
    %cst_97 = arith.constant 0.353553385 : f32
    %239 = vector.broadcast %cst_97 : f32 to vector<8x8xf32>
    %240 = arith.mulf %238, %239 : vector<8x8xf32>
    %241 = vector.broadcast %6 : vector<1x8xf32> to vector<8x8xf32>
    %242 = arith.addf %240, %241 : vector<8x8xf32>
    %cst_98 = arith.constant dense<0xFF800000> : vector<8xf32>
    %243 = vector.multi_reduction <maximumf>, %242, %cst_98 [1] : vector<8x8xf32> to vector<8xf32>
    %244 = vector.shape_cast %243 : vector<8xf32> to vector<8x1xf32>
    %245 = vector.broadcast %244 : vector<8x1xf32> to vector<8x8xf32>
    %246 = arith.subf %242, %245 : vector<8x8xf32>
    %247 = math.exp %246 : vector<8x8xf32>
    %cst_99 = arith.constant dense<0.000000e+00> : vector<8xf32>
    %248 = vector.multi_reduction <add>, %247, %cst_99 [1] : vector<8x8xf32> to vector<8xf32>
    %249 = vector.shape_cast %248 : vector<8xf32> to vector<8x1xf32>
    %250 = tpu.reciprocal %249 {approx = true} : vector<8x1xf32> -> vector<8x1xf32>
    %251 = vector.broadcast %250 : vector<8x1xf32> to vector<8x8xf32>
    %252 = arith.mulf %247, %251 : vector<8x8xf32>
    %253 = arith.truncf %252 : vector<8x8xf32> to vector<8x8xbf16>
    %254 = arith.truncf %235 : vector<8x8xf32> to vector<8x8xbf16>
    %cst_100 = arith.constant dense<0.000000e+00> : vector<8x8xf32>
    %255 = tpu.matmul %253, %254, %cst_100 {dimension_numbers = #tpu.dot_dimension_numbers<[1], [0], [0], [1], [0, 0, 1, 1], [], []>} : vector<8x8xbf16>, vector<8x8xbf16>, vector<8x8xf32> -> vector<8x8xf32>
    %256 = vector.extract_strided_slice %232 {offsets = [0, 8], sizes = [8, 8], strides = [1, 1]} : vector<8x96xf32> to vector<8x8xf32>
    %257 = vector.extract_strided_slice %232 {offsets = [0, 40], sizes = [8, 8], strides = [1, 1]} : vector<8x96xf32> to vector<8x8xf32>
    %258 = vector.extract_strided_slice %232 {offsets = [0, 72], sizes = [8, 8], strides = [1, 1]} : vector<8x96xf32> to vector<8x8xf32>
    %259 = arith.truncf %256 : vector<8x8xf32> to vector<8x8xbf16>
    %260 = arith.truncf %257 : vector<8x8xf32> to vector<8x8xbf16>
    %cst_101 = arith.constant dense<0.000000e+00> : vector<8x8xf32>
    %261 = tpu.matmul %259, %260, %cst_101 {dimension_numbers = #tpu.dot_dimension_numbers<[1], [1], [0], [0], [0, 0, 1, 0], [], []>} : vector<8x8xbf16>, vector<8x8xbf16>, vector<8x8xf32> -> vector<8x8xf32>
    %cst_102 = arith.constant 0.353553385 : f32
    %262 = vector.broadcast %cst_102 : f32 to vector<8x8xf32>
    %263 = arith.mulf %261, %262 : vector<8x8xf32>
    %264 = vector.broadcast %6 : vector<1x8xf32> to vector<8x8xf32>
    %265 = arith.addf %263, %264 : vector<8x8xf32>
    %cst_103 = arith.constant dense<0xFF800000> : vector<8xf32>
    %266 = vector.multi_reduction <maximumf>, %265, %cst_103 [1] : vector<8x8xf32> to vector<8xf32>
    %267 = vector.shape_cast %266 : vector<8xf32> to vector<8x1xf32>
    %268 = vector.broadcast %267 : vector<8x1xf32> to vector<8x8xf32>
    %269 = arith.subf %265, %268 : vector<8x8xf32>
    %270 = math.exp %269 : vector<8x8xf32>
    %cst_104 = arith.constant dense<0.000000e+00> : vector<8xf32>
    %271 = vector.multi_reduction <add>, %270, %cst_104 [1] : vector<8x8xf32> to vector<8xf32>
    %272 = vector.shape_cast %271 : vector<8xf32> to vector<8x1xf32>
    %273 = tpu.reciprocal %272 {approx = true} : vector<8x1xf32> -> vector<8x1xf32>
    %274 = vector.broadcast %273 : vector<8x1xf32> to vector<8x8xf32>
    %275 = arith.mulf %270, %274 : vector<8x8xf32>
    %276 = arith.truncf %275 : vector<8x8xf32> to vector<8x8xbf16>
    %277 = arith.truncf %258 : vector<8x8xf32> to vector<8x8xbf16>
    %cst_105 = arith.constant dense<0.000000e+00> : vector<8x8xf32>
    %278 = tpu.matmul %276, %277, %cst_105 {dimension_numbers = #tpu.dot_dimension_numbers<[1], [0], [0], [1], [0, 0, 1, 1], [], []>} : vector<8x8xbf16>, vector<8x8xbf16>, vector<8x8xf32> -> vector<8x8xf32>
    %279 = vector.extract_strided_slice %232 {offsets = [0, 16], sizes = [8, 8], strides = [1, 1]} : vector<8x96xf32> to vector<8x8xf32>
    %280 = vector.extract_strided_slice %232 {offsets = [0, 48], sizes = [8, 8], strides = [1, 1]} : vector<8x96xf32> to vector<8x8xf32>
    %281 = vector.extract_strided_slice %232 {offsets = [0, 80], sizes = [8, 8], strides = [1, 1]} : vector<8x96xf32> to vector<8x8xf32>
    %282 = arith.truncf %279 : vector<8x8xf32> to vector<8x8xbf16>
    %283 = arith.truncf %280 : vector<8x8xf32> to vector<8x8xbf16>
    %cst_106 = arith.constant dense<0.000000e+00> : vector<8x8xf32>
    %284 = tpu.matmul %282, %283, %cst_106 {dimension_numbers = #tpu.dot_dimension_numbers<[1], [1], [0], [0], [0, 0, 1, 0], [], []>} : vector<8x8xbf16>, vector<8x8xbf16>, vector<8x8xf32> -> vector<8x8xf32>
    %cst_107 = arith.constant 0.353553385 : f32
    %285 = vector.broadcast %cst_107 : f32 to vector<8x8xf32>
    %286 = arith.mulf %284, %285 : vector<8x8xf32>
    %287 = vector.broadcast %6 : vector<1x8xf32> to vector<8x8xf32>
    %288 = arith.addf %286, %287 : vector<8x8xf32>
    %cst_108 = arith.constant dense<0xFF800000> : vector<8xf32>
    %289 = vector.multi_reduction <maximumf>, %288, %cst_108 [1] : vector<8x8xf32> to vector<8xf32>
    %290 = vector.shape_cast %289 : vector<8xf32> to vector<8x1xf32>
    %291 = vector.broadcast %290 : vector<8x1xf32> to vector<8x8xf32>
    %292 = arith.subf %288, %291 : vector<8x8xf32>
    %293 = math.exp %292 : vector<8x8xf32>
    %cst_109 = arith.constant dense<0.000000e+00> : vector<8xf32>
    %294 = vector.multi_reduction <add>, %293, %cst_109 [1] : vector<8x8xf32> to vector<8xf32>
    %295 = vector.shape_cast %294 : vector<8xf32> to vector<8x1xf32>
    %296 = tpu.reciprocal %295 {approx = true} : vector<8x1xf32> -> vector<8x1xf32>
    %297 = vector.broadcast %296 : vector<8x1xf32> to vector<8x8xf32>
    %298 = arith.mulf %293, %297 : vector<8x8xf32>
    %299 = arith.truncf %298 : vector<8x8xf32> to vector<8x8xbf16>
    %300 = arith.truncf %281 : vector<8x8xf32> to vector<8x8xbf16>
    %cst_110 = arith.constant dense<0.000000e+00> : vector<8x8xf32>
    %301 = tpu.matmul %299, %300, %cst_110 {dimension_numbers = #tpu.dot_dimension_numbers<[1], [0], [0], [1], [0, 0, 1, 1], [], []>} : vector<8x8xbf16>, vector<8x8xbf16>, vector<8x8xf32> -> vector<8x8xf32>
    %302 = vector.extract_strided_slice %232 {offsets = [0, 24], sizes = [8, 8], strides = [1, 1]} : vector<8x96xf32> to vector<8x8xf32>
    %303 = vector.extract_strided_slice %232 {offsets = [0, 56], sizes = [8, 8], strides = [1, 1]} : vector<8x96xf32> to vector<8x8xf32>
    %304 = vector.extract_strided_slice %232 {offsets = [0, 88], sizes = [8, 8], strides = [1, 1]} : vector<8x96xf32> to vector<8x8xf32>
    %305 = arith.truncf %302 : vector<8x8xf32> to vector<8x8xbf16>
    %306 = arith.truncf %303 : vector<8x8xf32> to vector<8x8xbf16>
    %cst_111 = arith.constant dense<0.000000e+00> : vector<8x8xf32>
    %307 = tpu.matmul %305, %306, %cst_111 {dimension_numbers = #tpu.dot_dimension_numbers<[1], [1], [0], [0], [0, 0, 1, 0], [], []>} : vector<8x8xbf16>, vector<8x8xbf16>, vector<8x8xf32> -> vector<8x8xf32>
    %cst_112 = arith.constant 0.353553385 : f32
    %308 = vector.broadcast %cst_112 : f32 to vector<8x8xf32>
    %309 = arith.mulf %307, %308 : vector<8x8xf32>
    %310 = vector.broadcast %6 : vector<1x8xf32> to vector<8x8xf32>
    %311 = arith.addf %309, %310 : vector<8x8xf32>
    %cst_113 = arith.constant dense<0xFF800000> : vector<8xf32>
    %312 = vector.multi_reduction <maximumf>, %311, %cst_113 [1] : vector<8x8xf32> to vector<8xf32>
    %313 = vector.shape_cast %312 : vector<8xf32> to vector<8x1xf32>
    %314 = vector.broadcast %313 : vector<8x1xf32> to vector<8x8xf32>
    %315 = arith.subf %311, %314 : vector<8x8xf32>
    %316 = math.exp %315 : vector<8x8xf32>
    %cst_114 = arith.constant dense<0.000000e+00> : vector<8xf32>
    %317 = vector.multi_reduction <add>, %316, %cst_114 [1] : vector<8x8xf32> to vector<8xf32>
    %318 = vector.shape_cast %317 : vector<8xf32> to vector<8x1xf32>
    %319 = tpu.reciprocal %318 {approx = true} : vector<8x1xf32> -> vector<8x1xf32>
    %320 = vector.broadcast %319 : vector<8x1xf32> to vector<8x8xf32>
    %321 = arith.mulf %316, %320 : vector<8x8xf32>
    %322 = arith.truncf %321 : vector<8x8xf32> to vector<8x8xbf16>
    %323 = arith.truncf %304 : vector<8x8xf32> to vector<8x8xbf16>
    %cst_115 = arith.constant dense<0.000000e+00> : vector<8x8xf32>
    %324 = tpu.matmul %322, %323, %cst_115 {dimension_numbers = #tpu.dot_dimension_numbers<[1], [0], [0], [1], [0, 0, 1, 1], [], []>} : vector<8x8xbf16>, vector<8x8xbf16>, vector<8x8xf32> -> vector<8x8xf32>
    %325 = tpu.concatenate %255, %278, %301, %324 in 1 : vector<8x8xf32>, vector<8x8xf32>, vector<8x8xf32>, vector<8x8xf32> -> vector<8x32xf32>
    %326 = arith.truncf %325 : vector<8x32xf32> to vector<8x32xbf16>
    %c1_116 = arith.constant 1 : index
    %c0_117 = arith.constant 0 : index
    %c0_118 = arith.constant 0 : index
    %327 = vector.load %arg7[%c1_116, %c0_117, %c0_118] : memref<2x32x32xbf16, #tpu.memory_space<vmem>>, vector<1x32x32xbf16>
    %328 = vector.shape_cast %327 : vector<1x32x32xbf16> to vector<32x32xbf16>
    %cst_119 = arith.constant dense<0.000000e+00> : vector<8x32xf32>
    %329 = tpu.matmul %326, %328, %cst_119 {dimension_numbers = #tpu.dot_dimension_numbers<[1], [0], [0], [1], [0, 0, 1, 1], [], []>} : vector<8x32xbf16>, vector<32x32xbf16>, vector<8x32xf32> -> vector<8x32xf32>
    %c1_120 = arith.constant 1 : index
    %c0_121 = arith.constant 0 : index
    %c0_122 = arith.constant 0 : index
    %330 = vector.load %arg8[%c1_120, %c0_121, %c0_122] : memref<2x1x32xf32, #tpu.memory_space<vmem>>, vector<1x1x32xf32>
    %331 = vector.shape_cast %330 : vector<1x1x32xf32> to vector<1x32xf32>
    %332 = vector.broadcast %331 : vector<1x32xf32> to vector<8x32xf32>
    %333 = arith.addf %329, %332 : vector<8x32xf32>
    %334 = arith.addf %333, %224 : vector<8x32xf32>
    %c1_123 = arith.constant 1 : index
    %c0_124 = arith.constant 0 : index
    %c0_125 = arith.constant 0 : index
    %335 = vector.load %arg9[%c1_123, %c0_124, %c0_125] : memref<2x1x32xf32, #tpu.memory_space<vmem>>, vector<1x1x32xf32>
    %336 = vector.shape_cast %335 : vector<1x1x32xf32> to vector<1x32xf32>
    %c1_126 = arith.constant 1 : index
    %c0_127 = arith.constant 0 : index
    %c0_128 = arith.constant 0 : index
    %337 = vector.load %arg10[%c1_126, %c0_127, %c0_128] : memref<2x1x32xf32, #tpu.memory_space<vmem>>, vector<1x1x32xf32>
    %338 = vector.shape_cast %337 : vector<1x1x32xf32> to vector<1x32xf32>
    %cst_129 = arith.constant dense<0.000000e+00> : vector<8xf32>
    %339 = vector.multi_reduction <add>, %334, %cst_129 [1] : vector<8x32xf32> to vector<8xf32>
    %340 = vector.shape_cast %339 : vector<8xf32> to vector<8x1xf32>
    %cst_130 = arith.constant 3.200000e+01 : f32
    %341 = vector.broadcast %cst_130 : f32 to vector<8x1xf32>
    %342 = arith.divf %340, %341 : vector<8x1xf32>
    %343 = vector.broadcast %342 : vector<8x1xf32> to vector<8x32xf32>
    %344 = arith.subf %334, %343 : vector<8x32xf32>
    %345 = arith.mulf %344, %344 : vector<8x32xf32>
    %cst_131 = arith.constant dense<0.000000e+00> : vector<8xf32>
    %346 = vector.multi_reduction <add>, %345, %cst_131 [1] : vector<8x32xf32> to vector<8xf32>
    %347 = vector.shape_cast %346 : vector<8xf32> to vector<8x1xf32>
    %cst_132 = arith.constant 3.200000e+01 : f32
    %348 = vector.broadcast %cst_132 : f32 to vector<8x1xf32>
    %349 = arith.divf %347, %348 : vector<8x1xf32>
    %350 = vector.broadcast %342 : vector<8x1xf32> to vector<8x32xf32>
    %351 = arith.subf %334, %350 : vector<8x32xf32>
    %cst_133 = arith.constant 9.99999996E-13 : f32
    %352 = vector.broadcast %cst_133 : f32 to vector<8x1xf32>
    %353 = arith.addf %349, %352 : vector<8x1xf32>
    %354 = math.rsqrt %353 : vector<8x1xf32>
    %355 = vector.broadcast %354 : vector<8x1xf32> to vector<8x32xf32>
    %356 = arith.mulf %351, %355 : vector<8x32xf32>
    %357 = vector.broadcast %336 : vector<1x32xf32> to vector<8x32xf32>
    %358 = arith.mulf %356, %357 : vector<8x32xf32>
    %359 = vector.broadcast %338 : vector<1x32xf32> to vector<8x32xf32>
    %360 = arith.addf %358, %359 : vector<8x32xf32>
    %361 = arith.truncf %360 : vector<8x32xf32> to vector<8x32xbf16>
    %c1_134 = arith.constant 1 : index
    %c0_135 = arith.constant 0 : index
    %c0_136 = arith.constant 0 : index
    %362 = vector.load %arg11[%c1_134, %c0_135, %c0_136] : memref<2x32x64xbf16, #tpu.memory_space<vmem>>, vector<1x32x64xbf16>
    %363 = vector.shape_cast %362 : vector<1x32x64xbf16> to vector<32x64xbf16>
    %cst_137 = arith.constant dense<0.000000e+00> : vector<8x64xf32>
    %364 = tpu.matmul %361, %363, %cst_137 {dimension_numbers = #tpu.dot_dimension_numbers<[1], [0], [0], [1], [0, 0, 1, 1], [], []>} : vector<8x32xbf16>, vector<32x64xbf16>, vector<8x64xf32> -> vector<8x64xf32>
    %c1_138 = arith.constant 1 : index
    %c0_139 = arith.constant 0 : index
    %c0_140 = arith.constant 0 : index
    %365 = vector.load %arg12[%c1_138, %c0_139, %c0_140] : memref<2x1x64xf32, #tpu.memory_space<vmem>>, vector<1x1x64xf32>
    %366 = vector.shape_cast %365 : vector<1x1x64xf32> to vector<1x64xf32>
    %367 = vector.broadcast %366 : vector<1x64xf32> to vector<8x64xf32>
    %368 = arith.addf %364, %367 : vector<8x64xf32>
    %cst_141 = arith.constant 5.000000e-01 : f32
    %369 = vector.broadcast %cst_141 : f32 to vector<8x64xf32>
    %370 = arith.mulf %369, %368 : vector<8x64xf32>
    %cst_142 = arith.constant 4.471500e-02 : f32
    %371 = vector.broadcast %cst_142 : f32 to vector<8x64xf32>
    %372 = arith.mulf %371, %368 : vector<8x64xf32>
    %373 = arith.mulf %372, %368 : vector<8x64xf32>
    %374 = arith.mulf %373, %368 : vector<8x64xf32>
    %375 = arith.addf %368, %374 : vector<8x64xf32>
    %cst_143 = arith.constant 0.797884583 : f32
    %376 = vector.broadcast %cst_143 : f32 to vector<8x64xf32>
    %377 = arith.mulf %376, %375 : vector<8x64xf32>
    %378 = math.tanh %377 : vector<8x64xf32>
    %cst_144 = arith.constant 1.000000e+00 : f32
    %379 = vector.broadcast %cst_144 : f32 to vector<8x64xf32>
    %380 = arith.addf %379, %378 : vector<8x64xf32>
    %381 = arith.mulf %370, %380 : vector<8x64xf32>
    %382 = arith.truncf %381 : vector<8x64xf32> to vector<8x64xbf16>
    %c1_145 = arith.constant 1 : index
    %c0_146 = arith.constant 0 : index
    %c0_147 = arith.constant 0 : index
    %383 = vector.load %arg13[%c1_145, %c0_146, %c0_147] : memref<2x64x32xbf16, #tpu.memory_space<vmem>>, vector<1x64x32xbf16>
    %384 = vector.shape_cast %383 : vector<1x64x32xbf16> to vector<64x32xbf16>
    %cst_148 = arith.constant dense<0.000000e+00> : vector<8x32xf32>
    %385 = tpu.matmul %382, %384, %cst_148 {dimension_numbers = #tpu.dot_dimension_numbers<[1], [0], [0], [1], [0, 0, 1, 1], [], []>} : vector<8x64xbf16>, vector<64x32xbf16>, vector<8x32xf32> -> vector<8x32xf32>
    %c1_149 = arith.constant 1 : index
    %c0_150 = arith.constant 0 : index
    %c0_151 = arith.constant 0 : index
    %386 = vector.load %arg14[%c1_149, %c0_150, %c0_151] : memref<2x1x32xf32, #tpu.memory_space<vmem>>, vector<1x1x32xf32>
    %387 = vector.shape_cast %386 : vector<1x1x32xf32> to vector<1x32xf32>
    %388 = vector.broadcast %387 : vector<1x32xf32> to vector<8x32xf32>
    %389 = arith.addf %385, %388 : vector<8x32xf32>
    %390 = arith.addf %389, %360 : vector<8x32xf32>
    %c1_152 = arith.constant 1 : index
    %c0_153 = arith.constant 0 : index
    %c0_154 = arith.constant 0 : index
    %391 = vector.load %arg15[%c1_152, %c0_153, %c0_154] : memref<2x1x32xf32, #tpu.memory_space<vmem>>, vector<1x1x32xf32>
    %392 = vector.shape_cast %391 : vector<1x1x32xf32> to vector<1x32xf32>
    %c1_155 = arith.constant 1 : index
    %c0_156 = arith.constant 0 : index
    %c0_157 = arith.constant 0 : index
    %393 = vector.load %arg16[%c1_155, %c0_156, %c0_157] : memref<2x1x32xf32, #tpu.memory_space<vmem>>, vector<1x1x32xf32>
    %394 = vector.shape_cast %393 : vector<1x1x32xf32> to vector<1x32xf32>
    %cst_158 = arith.constant dense<0.000000e+00> : vector<8xf32>
    %395 = vector.multi_reduction <add>, %390, %cst_158 [1] : vector<8x32xf32> to vector<8xf32>
    %396 = vector.shape_cast %395 : vector<8xf32> to vector<8x1xf32>
    %cst_159 = arith.constant 3.200000e+01 : f32
    %397 = vector.broadcast %cst_159 : f32 to vector<8x1xf32>
    %398 = arith.divf %396, %397 : vector<8x1xf32>
    %399 = vector.broadcast %398 : vector<8x1xf32> to vector<8x32xf32>
    %400 = arith.subf %390, %399 : vector<8x32xf32>
    %401 = arith.mulf %400, %400 : vector<8x32xf32>
    %cst_160 = arith.constant dense<0.000000e+00> : vector<8xf32>
    %402 = vector.multi_reduction <add>, %401, %cst_160 [1] : vector<8x32xf32> to vector<8xf32>
    %403 = vector.shape_cast %402 : vector<8xf32> to vector<8x1xf32>
    %cst_161 = arith.constant 3.200000e+01 : f32
    %404 = vector.broadcast %cst_161 : f32 to vector<8x1xf32>
    %405 = arith.divf %403, %404 : vector<8x1xf32>
    %406 = vector.broadcast %398 : vector<8x1xf32> to vector<8x32xf32>
    %407 = arith.subf %390, %406 : vector<8x32xf32>
    %cst_162 = arith.constant 9.99999996E-13 : f32
    %408 = vector.broadcast %cst_162 : f32 to vector<8x1xf32>
    %409 = arith.addf %405, %408 : vector<8x1xf32>
    %410 = math.rsqrt %409 : vector<8x1xf32>
    %411 = vector.broadcast %410 : vector<8x1xf32> to vector<8x32xf32>
    %412 = arith.mulf %407, %411 : vector<8x32xf32>
    %413 = vector.broadcast %392 : vector<1x32xf32> to vector<8x32xf32>
    %414 = arith.mulf %412, %413 : vector<8x32xf32>
    %415 = vector.broadcast %394 : vector<1x32xf32> to vector<8x32xf32>
    %416 = arith.addf %414, %415 : vector<8x32xf32>
    %417 = vector.extract_strided_slice %416 {offsets = [0, 0], sizes = [1, 32], strides = [1, 1]} : vector<8x32xf32> to vector<1x32xf32>
    %418 = arith.truncf %417 : vector<1x32xf32> to vector<1x32xbf16>
    %c0_163 = arith.constant 0 : index
    %c0_164 = arith.constant 0 : index
    %419 = vector.load %arg17[%c0_163, %c0_164] : memref<32x32xbf16, #tpu.memory_space<vmem>>, vector<32x32xbf16>
    %cst_165 = arith.constant dense<0.000000e+00> : vector<1x32xf32>
    %420 = tpu.matmul %418, %419, %cst_165 {dimension_numbers = #tpu.dot_dimension_numbers<[1], [0], [0], [1], [0, 0, 1, 1], [], []>} : vector<1x32xbf16>, vector<32x32xbf16>, vector<1x32xf32> -> vector<1x32xf32>
    %c0_166 = arith.constant 0 : index
    %c0_167 = arith.constant 0 : index
    %421 = vector.load %arg18[%c0_166, %c0_167] : memref<1x32xf32, #tpu.memory_space<vmem>>, vector<1x32xf32>
    %422 = arith.addf %420, %421 : vector<1x32xf32>
    %423 = math.tanh %422 : vector<1x32xf32>
    %424 = arith.truncf %423 : vector<1x32xf32> to vector<1x32xbf16>
    %c0_168 = arith.constant 0 : index
    %c0_169 = arith.constant 0 : index
    %425 = vector.load %arg19[%c0_168, %c0_169] : memref<32x128xbf16, #tpu.memory_space<vmem>>, vector<32x128xbf16>
    %cst_170 = arith.constant dense<0.000000e+00> : vector<1x128xf32>
    %426 = tpu.matmul %424, %425, %cst_170 {dimension_numbers = #tpu.dot_dimension_numbers<[1], [0], [0], [1], [0, 0, 1, 1], [], []>} : vector<1x32xbf16>, vector<32x128xbf16>, vector<1x128xf32> -> vector<1x128xf32>
    %c0_171 = arith.constant 0 : index
    %c0_172 = arith.constant 0 : index
    %427 = vector.load %arg20[%c0_171, %c0_172] : memref<1x128xf32, #tpu.memory_space<vmem>>, vector<1x128xf32>
    %428 = arith.addf %426, %427 : vector<1x128xf32>
    %c0_173 = arith.constant 0 : index
    %c0_174 = arith.constant 0 : index
    %c0_175 = arith.constant 0 : index
    %429 = vector.load %arg21[%c0_173, %c0_174, %c0_175] : memref<1x1x128xf32, #tpu.memory_space<vmem>>, vector<1x1x128xf32>
    %430 = vector.shape_cast %429 : vector<1x1x128xf32> to vector<1x128xf32>
    %431 = vector.shape_cast %428 : vector<1x128xf32> to vector<1x1x128xf32>
    tpu.vector_store %arg21[%c0_173, %c0_174, %c0_175], %431 {strides = array<i32>} : memref<1x1x128xf32, #tpu.memory_space<vmem>>, vector<1x1x128xf32>,
    return
  }
  func.func @transform_0(%arg0: i32) -> (i32, i32, i32) {
    %c0_i32 = arith.constant 0 : i32
    %c0_i32_0 = arith.constant 0 : i32
    %c0_i32_1 = arith.constant 0 : i32
    return %arg0, %c0_i32, %c0_i32_0 : i32, i32, i32
  }
  func.func @transform_1(%arg0: i32) -> (i32, i32, i32) {
    %c0_i32 = arith.constant 0 : i32
    %c0_i32_0 = arith.constant 0 : i32
    %c0_i32_1 = arith.constant 0 : i32
    return %arg0, %c0_i32, %c0_i32_0 : i32, i32, i32
  }
  func.func @transform_2(%arg0: i32) -> (i32, i32) {
    %c0_i32 = arith.constant 0 : i32
    %c0_i32_0 = arith.constant 0 : i32
    %c0_i32_1 = arith.constant 0 : i32
    return %c0_i32, %c0_i32_0 : i32, i32
  }
  func.func @transform_3(%arg0: i32) -> (i32, i32) {
    %c0_i32 = arith.constant 0 : i32
    %c0_i32_0 = arith.constant 0 : i32
    %c0_i32_1 = arith.constant 0 : i32
    return %c0_i32, %c0_i32_0 : i32, i32
  }
  func.func @transform_4(%arg0: i32) -> (i32, i32, i32) {
    %c0_i32 = arith.constant 0 : i32
    %c0_i32_0 = arith.constant 0 : i32
    %c0_i32_1 = arith.constant 0 : i32
    %c0_i32_2 = arith.constant 0 : i32
    return %c0_i32, %c0_i32_0, %c0_i32_1 : i32, i32, i32
  }
  func.func @transform_5(%arg0: i32) -> (i32, i32, i32) {
    %c0_i32 = arith.constant 0 : i32
    %c0_i32_0 = arith.constant 0 : i32
    %c0_i32_1 = arith.constant 0 : i32
    %c0_i32_2 = arith.constant 0 : i32
    return %c0_i32, %c0_i32_0, %c0_i32_1 : i32, i32, i32
  }
  func.func @transform_6(%arg0: i32) -> (i32, i32, i32) {
    %c0_i32 = arith.constant 0 : i32
    %c0_i32_0 = arith.constant 0 : i32
    %c0_i32_1 = arith.constant 0 : i32
    %c0_i32_2 = arith.constant 0 : i32
    return %c0_i32, %c0_i32_0, %c0_i32_1 : i32, i32, i32
  }
  func.func @transform_7(%arg0: i32) -> (i32, i32, i32) {
    %c0_i32 = arith.constant 0 : i32
    %c0_i32_0 = arith.constant 0 : i32
    %c0_i32_1 = arith.constant 0 : i32
    %c0_i32_2 = arith.constant 0 : i32
    return %c0_i32, %c0_i32_0, %c0_i32_1 : i32, i32, i32
  }
  func.func @transform_8(%arg0: i32) -> (i32, i32, i32) {
    %c0_i32 = arith.constant 0 : i32
    %c0_i32_0 = arith.constant 0 : i32
    %c0_i32_1 = arith.constant 0 : i32
    %c0_i32_2 = arith.constant 0 : i32
    return %c0_i32, %c0_i32_0, %c0_i32_1 : i32, i32, i32
  }
  func.func @transform_9(%arg0: i32) -> (i32, i32, i32) {
    %c0_i32 = arith.constant 0 : i32
    %c0_i32_0 = arith.constant 0 : i32
    %c0_i32_1 = arith.constant 0 : i32
    %c0_i32_2 = arith.constant 0 : i32
    return %c0_i32, %c0_i32_0, %c0_i32_1 : i32, i32, i32
  }
  func.func @transform_10(%arg0: i32) -> (i32, i32, i32) {
    %c0_i32 = arith.constant 0 : i32
    %c0_i32_0 = arith.constant 0 : i32
    %c0_i32_1 = arith.constant 0 : i32
    %c0_i32_2 = arith.constant 0 : i32
    return %c0_i32, %c0_i32_0, %c0_i32_1 : i32, i32, i32
  }
  func.func @transform_11(%arg0: i32) -> (i32, i32, i32) {
    %c0_i32 = arith.constant 0 : i32
    %c0_i32_0 = arith.constant 0 : i32
    %c0_i32_1 = arith.constant 0 : i32
    %c0_i32_2 = arith.constant 0 : i32
    return %c0_i32, %c0_i32_0, %c0_i32_1 : i32, i32, i32
  }
  func.func @transform_12(%arg0: i32) -> (i32, i32, i32) {
    %c0_i32 = arith.constant 0 : i32
    %c0_i32_0 = arith.constant 0 : i32
    %c0_i32_1 = arith.constant 0 : i32
    %c0_i32_2 = arith.constant 0 : i32
    return %c0_i32, %c0_i32_0, %c0_i32_1 : i32, i32, i32
  }
  func.func @transform_13(%arg0: i32) -> (i32, i32, i32) {
    %c0_i32 = arith.constant 0 : i32
    %c0_i32_0 = arith.constant 0 : i32
    %c0_i32_1 = arith.constant 0 : i32
    %c0_i32_2 = arith.constant 0 : i32
    return %c0_i32, %c0_i32_0, %c0_i32_1 : i32, i32, i32
  }
  func.func @transform_14(%arg0: i32) -> (i32, i32, i32) {
    %c0_i32 = arith.constant 0 : i32
    %c0_i32_0 = arith.constant 0 : i32
    %c0_i32_1 = arith.constant 0 : i32
    %c0_i32_2 = arith.constant 0 : i32
    return %c0_i32, %c0_i32_0, %c0_i32_1 : i32, i32, i32
  }
  func.func @transform_15(%arg0: i32) -> (i32, i32, i32) {
    %c0_i32 = arith.constant 0 : i32
    %c0_i32_0 = arith.constant 0 : i32
    %c0_i32_1 = arith.constant 0 : i32
    %c0_i32_2 = arith.constant 0 : i32
    return %c0_i32, %c0_i32_0, %c0_i32_1 : i32, i32, i32
  }
  func.func @transform_16(%arg0: i32) -> (i32, i32) {
    %c0_i32 = arith.constant 0 : i32
    %c0_i32_0 = arith.constant 0 : i32
    %c0_i32_1 = arith.constant 0 : i32
    return %c0_i32, %c0_i32_0 : i32, i32
  }
  func.func @transform_17(%arg0: i32) -> (i32, i32) {
    %c0_i32 = arith.constant 0 : i32
    %c0_i32_0 = arith.constant 0 : i32
    %c0_i32_1 = arith.constant 0 : i32
    return %c0_i32, %c0_i32_0 : i32, i32
  }
  func.func @transform_18(%arg0: i32) -> (i32, i32) {
    %c0_i32 = arith.constant 0 : i32
    %c0_i32_0 = arith.constant 0 : i32
    %c0_i32_1 = arith.constant 0 : i32
    return %c0_i32, %c0_i32_0 : i32, i32
  }
  func.func @transform_19(%arg0: i32) -> (i32, i32) {
    %c0_i32 = arith.constant 0 : i32
    %c0_i32_0 = arith.constant 0 : i32
    %c0_i32_1 = arith.constant 0 : i32
    return %c0_i32, %c0_i32_0 : i32, i32
  }
  func.func @transform_20(%arg0: i32) -> (i32, i32, i32) {
    %c0_i32 = arith.constant 0 : i32
    %c0_i32_0 = arith.constant 0 : i32
    %c0_i32_1 = arith.constant 0 : i32
    return %arg0, %c0_i32, %c0_i32_0 : i32, i32, i32
  }
}

</mosaic_0001>

<bundles_post_ra>
// kernel: cross_encoder_forward.1
= control target key start
LH: loop header
LB: loop body
LE: loop exit
PB: predicated region body
PF: predicated region fallthrough
CT: control target
= control target key end

     0   :  { %s2522_s0 = inlined_call_operand.vmem [shape: f32[2,8,32], index: 0, kind: input, shape index: {}]   ;;  %s2523_s1 = inlined_call_operand.vmem [shape: f32[2,1,8], index: 1, kind: input, shape index: {}]   ;;  %s2524_s2 = inlined_call_operand.vmem [shape: f32[1,32], index: 2, kind: input, shape index: {}]   ;;  %s2525_s3 = inlined_call_operand.vmem [shape: f32[1,32], index: 3, kind: input, shape index: {}]   ;;  %s2526_s4 = inlined_call_operand.vmem [shape: bf16[2,32,96], index: 4, kind: input, shape index: {}]   ;;  %s2527_s5 = inlined_call_operand.vmem [shape: f32[2,1,96], index: 5, kind: input, shape index: {}]   ;;  %s2528_s6 = inlined_call_operand.vmem [shape: bf16[2,32,32], index: 6, kind: input, shape index: {}]   ;;  %s2529_s7 = inlined_call_operand.vmem [shape: f32[2,1,32], index: 7, kind: input, shape index: {}]   ;;  %s2530_s8 = inlined_call_operand.vmem [shape: f32[2,1,32], index: 8, kind: input, shape index: {}]   ;;  %s2531_s9 = inlined_call_operand.vmem [shape: f32[2,1,32], index: 9, kind: input, shape index: {}]   ;;  %s2532_s10 = inlined_call_operand.vmem [shape: bf16[2,32,64], index: 10, kind: input, shape index: {}]   ;;  %s2533_s11 = inlined_call_operand.vmem [shape: f32[2,1,64], index: 11, kind: input, shape index: {}]   ;;  %s2534_s12 = inlined_call_operand.vmem [shape: bf16[2,64,32], index: 12, kind: input, shape index: {}]   ;;  %s2535_s13 = inlined_call_operand.vmem [shape: f32[2,1,32], index: 13, kind: input, shape index: {}]   ;;  %s2536_s14 = inlined_call_operand.vmem [shape: f32[2,1,32], index: 14, kind: input, shape index: {}]   ;;  %s2537_s15 = inlined_call_operand.vmem [shape: f32[2,1,32], index: 15, kind: input, shape index: {}]   ;;  %s2538_s16 = inlined_call_operand.vmem [shape: bf16[32,32], index: 16, kind: input, shape index: {}]   ;;  %s2539_s17 = inlined_call_operand.vmem [shape: f32[1,32], index: 17, kind: input, shape index: {}]   ;;  %s2540_s18 = inlined_call_operand.vmem [shape: bf16[32,128], index: 18, kind: input, shape index: {}]   ;;  %s2541_s19 = inlined_call_operand.vmem [shape: f32[1,128], index: 19, kind: input, shape index: {}]   ;;  %s2542_s20 = inlined_call_operand.vmem [shape: f32[2,1,128], index: 20, kind: output, shape index: {}]  }
   0x1   :  { %2556 = sst [smem:[#allocation2_spill]] %s2522_s0 }
   0x2   :  { %2557 = sst [smem:[#allocation3_spill]] %s2523_s1  ;;  %s2203_s1 = smov 0  }
   0x3   :  { %2558 = sst [smem:[#allocation4_spill]] %s2524_s2 }
   0x4   :  { %2559 = sst [smem:[#allocation5_spill]] %s2525_s3 }
   0x5   :  { %2560 = sst [smem:[#allocation6_spill]] %s2526_s4 }
   0x6 LB: > { %s1800_s22 = sadd.s32 4294967295, %s2080_s1   ;;  %p1804_p0 = scmp.ge.s32.totalorder %s2080_s1, 1  ;;  %s2080_s1 = sphi %s2203_s1, %s30_s1  }
   0x7   : > { %p569_p1 = scmp.lt.s32.totalorder %s2080_s1, 3 }
   0x9   : > { %p570_p2 = pnand %p1804_p0, %p569_p1 }
   0xa   : > { %p627_p3 = scmp.lt.s32.totalorder (!%p570_p2), %s1800_s22, 1  ;;  %s2561_s25 = sld [smem:[#allocation2_spill]] (!%p570_p2) }
   0xb   : > { %573 = sbr.rel (%p570_p2) target bundleno = 4334 (0x10ee), region = 100  ;;  %s2562_s28 = sld [smem:[#allocation6_spill]] (!%p570_p2) }
   0xc   : > { %s2563_s21 = sld [smem:[#allocation4_spill]] (!%p570_p2)  ;;  %s2548_s26 = smov (!%p570_p2), 104  }
   0xd   : > { %s2564_s2 = sld [smem:[#allocation5_spill]] (!%p570_p2)  ;;  %s2084_s27 = smov (!%p570_p2), 120  }
   0xe   : > { %s2085_s4 = smov (!%p570_p2), 96   ;;  %s2549_s29 = smov (!%p570_p2), 72  }
   0xf   : > { %s2555_s30 = smov (!%p570_p2), 88   ;;  %s2554_s0 = smov (!%p570_p2), 112  }
  0x10   : > { %s2579_s22 = smov (!%p627_p3, %s1800_s22), 1  ;;  %vm644_vm0 = vcmask 261120   ;;  %v2082_v2 = vmov 32.0   ;;  %v2008_v32 = vld [vmem:[%s2527_s5] ss:$0 sm:$0xff]  ;;  %vm723_vm5 = vcmask 64512  }
  0x11   : > { %s1805_s23 = sshll.u32 %s2579_s22, 3  ;;  %2024 = vrcp.f32 %v2082_v2  ;;  %v1959_v14 = vld [vmem:[%s2562_s28 + $0x8] sm:$0xff]  ;;  %v1958_v15 = vld [vmem:[%s2562_s28] sm:$0xff]  ;;  %v2090_v49 = vmov -1e+09   ;;  %s2546_s24 = smov 40  }
  0x12   : > { %s630_s3 = scalar_lea.vmem %s2561_s25, %s1805_s23  ;;  %712 = vmatpush.bf16.msra.mxu0 %v1959_v14  ;;  %v2006_v25 = vld [vmem:[%s2563_s21] ss:$0 sm:$0xff]  ;;  %s2553_s21 = smov 80   ;;  %vm765_vm7 = vcmask 1043456   ;;  %vm969_vm8 = vcmask 130048   ;;  %vm971_vm9 = vcmask 195584  }
  0x13   : > { %v641_v0 = vld [vmem:[%s630_s3] sm:$0xff]  ;;  %s2545_s3 = smov 64   ;;  %s2547_s23 = smov 56   ;;  %vm1126_vm13 = vcmask 523264  }
  0x14   : > { %v645_v1 = vsel %vm644_vm0, %v641_v0, 0.0  ;;  %v2007_v28 = vld [vmem:[%s2564_s2] ss:$0 sm:$0xff]  ;;  %s2565_s2 = sld [smem:[#allocation3_spill]] }
  0x15   : > { %646 = vadd.xlane.f32.xlu0 %v645_v1 }
  0x16   : > { %713 = vmatpush.bf16.msra.mxu0 %v1958_v15 }
  0x17   : > { %v2025_v3 = vpop.eup %2024 }
  0x18   : > { %v649_v4 = vmul.f32 32.0, %v2025_v3  ;;  %vm653_vm1 = vweird.f32 %v2025_v3 }
  0x1a   : > { %v650_v5 = vsub.f32 1.0, %v649_v4  ;;  %s633_s25 = scalar_lea.vmem %s2565_s2, %s2579_s22  ;;  %s2544_s2 = smov 48  }
  0x1b   : > { %v638_v48 = vld [vmem:[%s633_s25] sm:$0x1]  ;;  %s2552_s25 = smov 8  }
  0x1c   : > { %v651_v6 = vmul.f32 %v2025_v3, %v650_v5  ;;  %vm639_vm6 = vcmp.gt.f32.partialorder %v638_v48, 0.5 }
  0x1d   : > { %v640_v50 = vsel %vm639_vm6, 0.0, %v2090_v49 }
  0x1e   : > { %v652_v7 = vadd.f32 %v2025_v3, %v651_v6  ;;  %v2272_v51 = vperm.slane %v640_v50, 0 }
  0x20   : > { %v2218_v8 = vsel %vm653_vm1, %v2025_v3, %v652_v7 }
  0x88   : > { %v647_v9 = vpop.xlane.xlu0 %646 }
  0x89   : > { %v655_v10 = vmul.f32 %v2218_v8, %v647_v9 }
  0x8b   : > { %v656_v11 = vsub.f32 %v641_v0, %v655_v10 }
  0x8d   : > { %v657_v12 = vmul.f32 %v656_v11, %v656_v11 }
  0x8f   : > { %v658_v13 = vsel %vm644_vm0, %v657_v12, 0.0 }
  0x90   : > { %659 = vadd.xlane.f32.xlu0 %v658_v13 }
 0x103   : > { %v660_v16 = vpop.xlane.xlu0 %659 }
 0x104   : > { %v661_v17 = vmul.f32 %v660_v16, %v2218_v8 }
 0x106   : > { %v662_v18 = vadd.f32 1e-12, %v661_v17 }
 0x108   : > { %2026 = vrsqrt.f32 %v662_v18  ;;  %vm669_vm3 = vweird.f32 %v662_v18 }
 0x10e   : > { %v2027_v19 = vpop.eup %2026 }
 0x10f   : > { %v664_v20 = vmul.f32 %v2027_v19, %v662_v18  ;;  %vm670_vm2 = vweird.f32 %v2027_v19 }
 0x110   : > { %vm671_vm4 = vmor %vm669_vm3, %vm670_vm2 }
 0x111   : > { %v665_v21 = vmul.f32 %v2027_v19, %v664_v20 }
 0x113   : > { %v666_v22 = vmul.f32 0.5, %v665_v21 }
 0x115   : > { %v667_v23 = vsub.f32 1.5, %v666_v22 }
 0x117   : > { %v668_v24 = vmul.f32 %v2027_v19, %v667_v23 }
 0x119   : > { %v672_v26 = vsel %vm671_vm4, %v2027_v19, %v668_v24 }
 0x11a   : > { %v673_v27 = vmul.f32 %v672_v26, %v656_v11 }
 0x11c   : > { %v677_v29 = vmul.f32 %v2006_v25, %v673_v27 }
 0x11e   : > { %v2235_v30 = vadd.f32 %v2007_v28, %v677_v29 }
 0x120   : > { %v682_v31 = vpack.c.bf16 %v2235_v30, %v2235_v30 }
 0x122   : > { %1814 = vmatmul.msk.bf16.vlgmr.msra.gmra.mxu0 %vm644_vm0, %v682_v31 }
 0x19f   : > { %v715_v33 = vpop.f32.mrf.mxu0 }
 0x1a0   : > { %v716_v34 = vadd.f32 %v2008_v32, %v715_v33 }
 0x1a2   : > { %v2243_v35 = vpack.c.bf16 %v716_v34, %v716_v34 }
 0x1a4   : > { %898 = vrot.lane.b32.xlu0 %v2243_v35, %s2548_s26  ;;  %782 = vrot.lane.b32.xlu2 %v2243_v35, %s2084_s27  ;;  %s2570_s26 = smov 104  }
 0x1a5   : > { %721 = vrot.lane.b32.xlu1 %v2243_v35, %s2085_s4 }
 0x1a7   : > { %v717_v36 = vpop.f32.mrf.mxu0 }
 0x1ac   : > { %900 = vrot.lane.b32.xlu2 %v2243_v35, %s2549_s29  ;;  %s2573_s29 = smov 64  }
 0x1ad   : > { %784 = vrot.lane.b32.xlu1 %v2243_v35, %s2555_s30  ;;  %s2577_s30 = smov 16  }
 0x1b4   : > { %840 = vrot.lane.b32.xlu2 %v2243_v35, %s2554_s0  ;;  %s2566_s0 = smov 88  }
 0x1b5   : > { %842 = vrot.lane.b32.xlu1 %v2243_v35, %s2553_s21  ;;  %s2576_s21 = smov 24  }
 0x1fe   : > { %v783_v37 = vpop.permute.xlu2 %782 }
 0x206   : > { %v901_v40 = vpop.permute.xlu2 %900 }
 0x207   : > { %v906_v43 = vsel %vm723_vm5, %v901_v40, 0 }
 0x20e   : > { %v841_v46 = vpop.permute.xlu2 %840 }
 0x216   : > { %v899_v47 = vpop.permute.xlu0 %898 }
 0x217   : > { %v722_v38 = vpop.permute.xlu1 %721 }
 0x218   : > { %v728_v39 = vsel %vm723_vm5, %v722_v38, 0 }
 0x219   : > { %737 = vmatpush.bf16.xpose.msra.mxu1 %v728_v39 }
 0x21f   : > { %v785_v41 = vpop.permute.xlu1 %784 }
 0x220   : > { %1815 = vmatmul.msk.bf16.vlgmr.msra.gmra.mxu1 %vm723_vm5, %v2243_v35  ;;  %v790_v42 = vsel %vm723_vm5, %v785_v41, 0 }
 0x221   : > { %799 = vmatpush.bf16.xpose.msra.mxu3 %v790_v42 }
 0x227   : > { %v843_v44 = vpop.permute.xlu1 %842 }
 0x228   : > { %1817 = vmatmul.msk.bf16.vlgmr.msra.gmra.mxu3 %vm723_vm5, %v783_v37  ;;  %v848_v45 = vsel %vm723_vm5, %v843_v44, 0 }
 0x229   : > { %915 = vmatpush.bf16.xpose.msrb.mxu3 %v906_v43  ;;  %857 = vmatpush.bf16.xpose.msrb.mxu0 %v848_v45 }
 0x230   : > { %1819 = vmatmul.msk.bf16.vlgmr.msrb.gmra.mxu0 %vm723_vm5, %v841_v46 }
 0x238   : > { %1821 = vmatmul.msk.bf16.vlgmr.msrb.gmra.mxu3 %vm723_vm5, %v899_v47 }
 0x29d   : > { %v739_v52 = vpop.f32.mrf.mxu1 }
 0x29e   : > { %v743_v53 = vmul.f32 0.35355338, %v739_v52 }
 0x2a0   : > { %v747_v54 = vadd.f32 %v2272_v51, %v743_v53 }
 0x2a2   : > { %v748_v55 = vsel %vm723_vm5, %v747_v54, -inf }
 0x2a3   : > { %749 = vmax.xlane.f32.xlu1 %v748_v55 }
 0x2a5   : > { %v741_v56 = vpop.f32.mrf.mxu1 }
 0x2ab   : > { %v801_v57 = vpop.f32.mrf.mxu3 }
 0x2ac   : > { %v805_v58 = vmul.f32 0.35355338, %v801_v57 }
 0x2ad   : > { %v859_v59 = vpop.f32.mrf.mxu0 }
 0x2ae   : > { %v806_v60 = vadd.f32 %v805_v58, %v2272_v51  ;;  %v863_v61 = vmul.f32 0.35355338, %v859_v59 }
 0x2b0   : > { %v807_v62 = vsel %vm723_vm5, %v806_v60, -inf  ;;  %v864_v0 = vadd.f32 %v863_v61, %v2272_v51 }
 0x2b1   : > { %808 = vmax.xlane.f32.xlu2 %v807_v62 }
 0x2b2   : > { %v865_v2 = vsel %vm723_vm5, %v864_v0, -inf }
 0x2b3   : > { %v803_v63 = vpop.f32.mrf.mxu3 }
 0x2b4   : > { %v1961_v63 = vld [vmem:[%s2528_s6 + $0x8] sm:$0xff] }
 0x2b5   : > { %v861_v1 = vpop.f32.mrf.mxu0  ;;  %1003 = vmatpush.bf16.msra.mxu0 %v1961_v63 }
 0x2b9   : > { %866 = vmax.xlane.f32.xlu2 %v865_v2 }
 0x2bb   : > { %v917_v3 = vpop.f32.mrf.mxu3 }
 0x2bc   : > { %v921_v4 = vmul.f32 0.35355338, %v917_v3 }
 0x2be   : > { %v922_v5 = vadd.f32 %v921_v4, %v2272_v51 }
 0x2c0   : > { %v923_v6 = vsel %vm723_vm5, %v922_v5, -inf }
 0x2c1   : > { %924 = vmax.xlane.f32.xlu0 %v923_v6 }
 0x2c3   : > { %v919_v7 = vpop.f32.mrf.mxu3 }
 0x2d1   : > { %760 = vrot.lane.b32.xlu2 %v2243_v35, %s2545_s3  ;;  %s2550_s3 = smov 16  }
 0x2d5   : > { %819 = vrot.lane.b32.xlu0 %v2243_v35, %s2547_s23  ;;  %s2574_s23 = smov 48  }
 0x2d9   : > { %935 = vrot.lane.b32.xlu2 %v2243_v35, %s2546_s24  ;;  %s2575_s24 = smov 8  }
 0x2dd   : > { %877 = vrot.lane.b32.xlu0 %v2243_v35, %s2544_s2  ;;  %s2551_s2 = smov 24  }
 0x316   : > { %v750_v9 = vpop.xlane.xlu1 %749 }
 0x317   : > { %v751_v10 = vsub.f32 %v747_v54, %v750_v9  ;;  %v2009_v9 = vld [vmem:[%s2529_s7] ss:$0 sm:$0xff] }
 0x319   : > { %v752_v11 = vmul.f32 1.442695, %v751_v10 }
 0x31b   : > { %2028 = vpow2.f32 %v752_v11 }
 0x321   : > { %v2029_v12 = vpop.eup %2028 }
 0x322   : > { %v754_v13 = vsel %vm723_vm5, %v2029_v12, 0.0 }
 0x323   : > { %755 = vadd.xlane.f32.xlu1 %v754_v13 }
 0x324   : > { %v809_v14 = vpop.xlane.xlu2 %808 }
 0x325   : > { %v810_v15 = vsub.f32 %v806_v60, %v809_v14 }
 0x327   : > { %v811_v16 = vmul.f32 1.442695, %v810_v15 }
 0x329   : > { %2030 = vpow2.f32 %v811_v16 }
 0x32c   : > { %v867_v17 = vpop.xlane.xlu2 %866 }
 0x32d   : > { %v868_v24 = vsub.f32 %v864_v0, %v867_v17  ;;  %v1960_v0 = vld [vmem:[%s2528_s6] sm:$0xff] }
 0x32e   : > { %1004 = vmatpush.bf16.msra.mxu0 %v1960_v0 }
 0x32f   : > { %v2031_v18 = vpop.eup %2030  ;;  %v869_v26 = vmul.f32 1.442695, %v868_v24 }
 0x330   : > { %v813_v19 = vsel %vm723_vm5, %v2031_v18, 0.0 }
 0x331   : > { %814 = vadd.xlane.f32.xlu1 %v813_v19 }
 0x334   : > { %v925_v20 = vpop.xlane.xlu0 %924  ;;  %v761_v21 = vpop.permute.xlu2 %760 }
 0x335   : > { %v926_v22 = vsub.f32 %v922_v5, %v925_v20  ;;  %v767_v23 = vsel %vm765_vm7, %v761_v21, 0  ;;  %v1963_v20 = vld [vmem:[%s2532_s10 + $0x8] sm:$0xff] }
 0x336   : > { %776 = vmatpush.bf16.msra.mxu2 %v767_v23 }
 0x337   : > { %v927_v25 = vmul.f32 1.442695, %v926_v22 }
 0x339   : > { %2032 = vpow2.f32 %v927_v25 }
 0x33a   : > { %2034 = vpow2.f32 %v869_v26 }
 0x33c   : > { %v936_v39 = vpop.permute.xlu2 %935 }
 0x33d   : > { %v941_v41 = vsel %vm765_vm7, %v936_v39, 0  ;;  %v1966_v39 = vld [vmem:[%s2534_s12 + $0x10] sm:$0xff] }
 0x33f   : > { %v2033_v27 = vpop.eup %2032 }
 0x340   : > { %v929_v28 = vsel %vm723_vm5, %v2033_v27, 0.0  ;;  %v2035_v29 = vpop.eup %2034 }
 0x341   : > { %930 = vadd.xlane.f32.xlu1 %v929_v28  ;;  %v871_v33 = vsel %vm723_vm5, %v2035_v29, 0.0 }
 0x347   : > { %v820_v31 = vpop.permute.xlu0 %819 }
 0x348   : > { %v825_v32 = vsel %vm765_vm7, %v820_v31, 0  ;;  %v2010_v31 = vld [vmem:[%s2530_s8] ss:$0 sm:$0xff] }
 0x349   : > { %834 = vmatpush.bf16.msrb.mxu2 %v825_v32  ;;  %872 = vadd.xlane.f32.xlu1 %v871_v33  ;;  %v2011_v33 = vld [vmem:[%s2531_s9] ss:$0 sm:$0xff] }
 0x34f   : > { %v878_v34 = vpop.permute.xlu0 %877 }
 0x350   : > { %v883_v35 = vsel %vm765_vm7, %v878_v34, 0 }
 0x351   : > { %892 = vmatpush.bf16.msrb.mxu1 %v883_v35 }
 0x355   : > { %1073 = vmatpush.bf16.msra.mxu1 %v1963_v20 }
 0x396   : > { %v756_v36 = vpop.xlane.xlu1 %755 }
 0x397   : > { %2036 = vrcp.f32 %v756_v36 }
 0x39d   : > { %v2037_v37 = vpop.eup %2036 }
 0x39e   : > { %v758_v38 = vmul.f32 %v2037_v37, %v2029_v12 }
 0x3a0   : > { %v759_v40 = vpack.c.bf16 %v758_v38, %v758_v38  ;;  %v1967_v38 = vld [vmem:[%s2534_s12 + $0x18] sm:$0xff] }
 0x3a1   : > { %1134 = vmatpush.bf16.msra.mxu3 %v1967_v38 }
 0x3a2   : > { %1816 = vmatmul.msk.bf16.vlgmr.msra.gmra.mxu2 %vm723_vm5, %v759_v40  ;;  %v1965_v40 = vld [vmem:[%s2534_s12 + $0x8] sm:$0xff] }
 0x3a3   : > { %950 = vmatpush.bf16.msra.mxu2 %v941_v41  ;;  %v1964_v41 = vld [vmem:[%s2534_s12] sm:$0xff] }
 0x3a4   : > { %v815_v42 = vpop.xlane.xlu1 %814 }
 0x3a5   : > { %2038 = vrcp.f32 %v815_v42  ;;  %1135 = vmatpush.bf16.msra.mxu3 %v1966_v39  ;;  %v2012_v42 = vld [vmem:[%s2533_s11] ss:$0 sm:$0xff] }
 0x3a9   : > { %1136 = vmatpush.bf16.msra.mxu3 %v1965_v40 }
 0x3ab   : > { %v2039_v43 = vpop.eup %2038 }
 0x3ac   : > { %v817_v44 = vmul.f32 %v2039_v43, %v2031_v18 }
 0x3ad   : > { %1137 = vmatpush.bf16.msra.mxu3 %v1964_v41 }
 0x3ae   : > { %v818_v45 = vpack.c.bf16 %v817_v44, %v817_v44 }
 0x3b2   : > { %1818 = vmatmul.msk.bf16.vlgmr.msrb.gmra.mxu2 %vm723_vm5, %v818_v45 }
 0x3b4   : > { %v931_v46 = vpop.xlane.xlu1 %930 }
 0x3b5   : > { %2040 = vrcp.f32 %v931_v46 }
 0x3bb   : > { %v2041_v47 = vpop.eup %2040 }
 0x3bc   : > { %v933_v48 = vmul.f32 %v2041_v47, %v2033_v27  ;;  %v873_v49 = vpop.xlane.xlu1 %872 }
 0x3bd   : > { %2042 = vrcp.f32 %v873_v49 }
 0x3be   : > { %v934_v50 = vpack.c.bf16 %v933_v48, %v933_v48 }
 0x3c2   : > { %1822 = vmatmul.msk.bf16.vlgmr.msra.gmra.mxu2 %vm723_vm5, %v934_v50 }
 0x3c3   : > { %v2043_v52 = vpop.eup %2042 }
 0x3c4   : > { %v875_v53 = vmul.f32 %v2043_v52, %v2035_v29 }
 0x3c6   : > { %v876_v54 = vpack.c.bf16 %v875_v53, %v875_v53 }
 0x3c8   : > { %1820 = vmatmul.msk.bf16.vlgmr.msrb.gmra.mxu1 %vm723_vm5, %v876_v54 }
 0x425   : > { %v778_v55 = vpop.f32.mrf.mxu2 }
 0x42d   : > { %v780_v56 = vpop.f32.mrf.mxu2 }
 0x435   : > { %v836_v57 = vpop.f32.mrf.mxu2 }
 0x436   : > { %957 = vrot.lane.b32.xlu1 %v836_v57, %s2552_s25  ;;  %v2013_v57 = vld [vmem:[%s2535_s13] ss:$0 sm:$0xff]  ;;  %s2569_s25 = smov 72  }
 0x43d   : > { %v838_v58 = vpop.f32.mrf.mxu2 }
 0x445   : > { %v894_v59 = vpop.f32.mrf.mxu1  ;;  %v952_v60 = vpop.f32.mrf.mxu2 }
 0x446   : > { %965 = vrot.lane.b32.xlu0 %v952_v60, %s2551_s2  ;;  %961 = vrot.lane.b32.xlu2 %v894_v59, %s2550_s3  ;;  %s2567_s3 = smov 112   ;;  %s2568_s2 = smov 80  }
 0x44d   : > { %v896_v61 = vpop.f32.mrf.mxu1  ;;  %v954_v62 = vpop.f32.mrf.mxu2 }
 0x4a0   : > { %v962_v3 = vpop.permute.xlu2 %961 }
 0x4a8   : > { %v958_v1 = vpop.permute.xlu1 %957 }
 0x4a9   : > { %v968_v2 = vsel %vm723_vm5, %v778_v55, %v958_v1 }
 0x4aa   : > { %v970_v5 = vsel %vm969_vm8, %v968_v2, %v962_v3 }
 0x4b8   : > { %v966_v4 = vpop.permute.xlu0 %965 }
 0x4b9   : > { %v972_v6 = vsel %vm971_vm9, %v970_v5, %v966_v4  ;;  %v1969_v4 = vld [vmem:[%s2562_s28 + $0x18] sm:$0xff]  ;;  %v1968_v5 = vld [vmem:[%s2562_s28 + $0x10] sm:$0xff] }
 0x4ba   : > { %v973_v7 = vpack.c.bf16 %v972_v6, %v972_v6  ;;  %1208 = vmatpush.bf16.msrb.mxu2 %v1969_v4 }
 0x4bc   : > { %1831 = vmatmul.msk.bf16.vlgmr.msra.gmra.mxu0 %vm644_vm0, %v973_v7 }
 0x4be   : > { %1209 = vmatpush.bf16.msrb.mxu2 %v1968_v5 }
 0x539   : > { %v1006_v10 = vpop.f32.mrf.mxu0 }
 0x53a   : > { %v1007_v11 = vadd.f32 %v2009_v9, %v1006_v10 }
 0x53c   : > { %v1010_v12 = vadd.f32 %v1007_v11, %v2235_v30  ;;  %v1962_v30 = vld [vmem:[%s2532_s10] sm:$0xff] }
 0x53d   : > { %1074 = vmatpush.bf16.msra.mxu1 %v1962_v30 }
 0x53e   : > { %v1013_v13 = vsel %vm644_vm0, %v1010_v12, 0.0 }
 0x53f   : > { %1014 = vadd.xlane.f32.xlu2 %v1013_v13 }
 0x541   : > { %v1008_v14 = vpop.f32.mrf.mxu0 }
 0x5b2   : > { %v1015_v15 = vpop.xlane.xlu2 %1014 }
 0x5b3   : > { %v1016_v16 = vmul.f32 %v1015_v15, %v2218_v8 }
 0x5b5   : > { %v1017_v17 = vsub.f32 %v1010_v12, %v1016_v16  ;;  %v2014_v16 = vld [vmem:[%s2536_s14] ss:$0 sm:$0xff] }
 0x5b7   : > { %v1018_v18 = vmul.f32 %v1017_v17, %v1017_v17 }
 0x5b9   : > { %v1019_v19 = vsel %vm644_vm0, %v1018_v18, 0.0  ;;  %v2015_v18 = vld [vmem:[%s2537_s15] ss:$0 sm:$0xff] }
 0x5ba   : > { %1020 = vadd.xlane.f32.xlu0 %v1019_v19 }
 0x62d   : > { %v1021_v21 = vpop.xlane.xlu0 %1020 }
 0x62e   : > { %v1022_v22 = vmul.f32 %v1021_v21, %v2218_v8 }
 0x630   : > { %v1023_v23 = vadd.f32 1e-12, %v1022_v22  ;;  %v2016_v22 = vld [vmem:[%s2527_s5 + $0x1] ss:$0 sm:$0xff] }
 0x632   : > { %2044 = vrsqrt.f32 %v1023_v23  ;;  %vm1030_vm11 = vweird.f32 %v1023_v23 }
 0x638   : > { %v2045_v24 = vpop.eup %2044 }
 0x639   : > { %v1025_v25 = vmul.f32 %v2045_v24, %v1023_v23  ;;  %vm1031_vm10 = vweird.f32 %v2045_v24 }
 0x63a   : > { %vm1032_vm12 = vmor %vm1030_vm11, %vm1031_vm10 }
 0x63b   : > { %v1026_v26 = vmul.f32 %v2045_v24, %v1025_v25 }
 0x63d   : > { %v1027_v27 = vmul.f32 0.5, %v1026_v26 }
 0x63f   : > { %v1028_v28 = vsub.f32 1.5, %v1027_v27 }
 0x641   : > { %v1029_v29 = vmul.f32 %v2045_v24, %v1028_v28 }
 0x643   : > { %v1033_v32 = vsel %vm1032_vm12, %v2045_v24, %v1029_v29 }
 0x644   : > { %v1034_v34 = vmul.f32 %v1033_v32, %v1017_v17 }
 0x646   : > { %v1038_v35 = vmul.f32 %v2010_v31, %v1034_v34 }
 0x648   : > { %v1042_v36 = vadd.f32 %v2011_v33, %v1038_v35 }
 0x64a   : > { %v1043_v37 = vpack.c.bf16 %v1042_v36, %v1042_v36 }
 0x64c   : > { %1840 = vmatmul.msk.bf16.vlgmr.msra.gmra.mxu1 %vm644_vm0, %v1043_v37 }
 0x6c9   : > { %v1076_v43 = vpop.f32.mrf.mxu1 }
 0x6ca   : > { %v1077_v44 = vadd.f32 %v2012_v42, %v1076_v43 }
 0x6cc   : > { %v1081_v45 = vmul.f32 0.044715, %v1077_v44  ;;  %v1080_v53 = vmul.f32 0.5, %v1077_v44 }
 0x6ce   : > { %v1082_v46 = vmul.f32 %v1081_v45, %v1077_v44 }
 0x6d0   : > { %v1083_v47 = vmul.f32 %v1082_v46, %v1077_v44 }
 0x6d1   : > { %v1078_v48 = vpop.f32.mrf.mxu1 }
 0x6d2   : > { %v1084_v49 = vadd.f32 %v1083_v47, %v1077_v44 }
 0x6d4   : > { %v1085_v50 = vmul.f32 0.7978846, %v1084_v49 }
 0x6d6   : > { %2046 = vtanh.f32 %v1085_v50 }
 0x6dc   : > { %v2047_v52 = vpop.eup %2046 }
 0x6dd   : > { %v1087_v54 = vadd.f32 1.0, %v2047_v52 }
 0x6df   : > { %v1088_v55 = vmul.f32 %v1087_v54, %v1080_v53 }
 0x6e1   : > { %v1089_v56 = vpack.c.bf16 %v1088_v55, %v1088_v55 }
 0x6e3   : > { %1857 = vmatmul.msk.bf16.vlgmr.msra.gmra.mxu3 %vm1126_vm13, %v1089_v56 }
 0x766   : > { %v1139_v58 = vpop.f32.mrf.mxu3 }
 0x767   : > { %v1140_v59 = vadd.f32 %v2013_v57, %v1139_v58 }
 0x769   : > { %v1143_v60 = vadd.f32 %v1140_v59, %v1042_v36 }
 0x76b   : > { %v1146_v61 = vsel %vm644_vm0, %v1143_v60, 0.0 }
 0x76c   : > { %1147 = vadd.xlane.f32.xlu1 %v1146_v61 }
 0x76e   : > { %v1141_v62 = vpop.f32.mrf.mxu3 }
 0x7df   : > { %v1148_v63 = vpop.xlane.xlu1 %1147 }
 0x7e0   : > { %v1149_v0 = vmul.f32 %v1148_v63, %v2218_v8 }
 0x7e2   : > { %v1150_v1 = vsub.f32 %v1143_v60, %v1149_v0 }
 0x7e4   : > { %v1151_v2 = vmul.f32 %v1150_v1, %v1150_v1 }
 0x7e6   : > { %v1152_v3 = vsel %vm644_vm0, %v1151_v2, 0.0 }
 0x7e7   : > { %1153 = vadd.xlane.f32.xlu2 %v1152_v3 }
 0x85a   : > { %v1154_v6 = vpop.xlane.xlu2 %1153 }
 0x85b   : > { %v1155_v7 = vmul.f32 %v1154_v6, %v2218_v8 }
 0x85d   : > { %v1156_v9 = vadd.f32 1e-12, %v1155_v7 }
 0x85f   : > { %2048 = vrsqrt.f32 %v1156_v9  ;;  %vm1163_vm15 = vweird.f32 %v1156_v9 }
 0x865   : > { %v2049_v10 = vpop.eup %2048 }
 0x866   : > { %v1158_v11 = vmul.f32 %v2049_v10, %v1156_v9  ;;  %vm1164_vm14 = vweird.f32 %v2049_v10 }
 0x867   : > { %vm1165_vm1 = vmor %vm1163_vm15, %vm1164_vm14 }
 0x868   : > { %v1159_v12 = vmul.f32 %v2049_v10, %v1158_v11 }
 0x86a   : > { %v1160_v13 = vmul.f32 0.5, %v1159_v12 }
 0x86c   : > { %v1161_v14 = vsub.f32 1.5, %v1160_v13 }
 0x86e   : > { %v1162_v15 = vmul.f32 %v2049_v10, %v1161_v14 }
 0x870   : > { %v1166_v17 = vsel %vm1165_vm1, %v2049_v10, %v1162_v15 }
 0x871   : > { %v1167_v19 = vmul.f32 %v1166_v17, %v1150_v1 }
 0x873   : > { %v1171_v20 = vmul.f32 %v2014_v16, %v1167_v19 }
 0x875   : > { %v2371_v30 = vadd.f32 %v2015_v18, %v1171_v20 }
 0x877   : > { %v1176_v21 = vpack.c.bf16 %v2371_v30, %v2371_v30 }
 0x879   : > { %1871 = vmatmul.msk.bf16.vlgmr.msrb.gmra.mxu2 %vm644_vm0, %v1176_v21 }
 0x8fc   : > { %v1211_v23 = vpop.f32.mrf.mxu2 }
 0x8fd   : > { %v1212_v24 = vadd.f32 %v2016_v22, %v1211_v23 }
 0x8ff   : > { %v2379_v25 = vpack.c.bf16 %v1212_v24, %v1212_v24 }
 0x901   : > { %1217 = vrot.lane.b32.xlu1 %v2379_v25, %s2085_s4  ;;  %1273 = vrot.lane.b32.xlu2 %v2379_v25, %s2084_s27  ;;  %s2571_s27 = smov 56   ;;  %s2572_s4 = smov 40  }
 0x902   : > { %1275 = vrot.lane.b32.xlu0 %v2379_v25, %s2566_s0 }
 0x904   : > { %v1213_v26 = vpop.f32.mrf.mxu2 }
 0x909   : > { %1331 = vrot.lane.b32.xlu1 %v2379_v25, %s2567_s3  ;;  %1333 = vrot.lane.b32.xlu2 %v2379_v25, %s2568_s2 }
 0x90a   : > { %1391 = vrot.lane.b32.xlu0 %v2379_v25, %s2569_s25 }
 0x912   : > { %1389 = vrot.lane.b32.xlu0 %v2379_v25, %s2570_s26 }
 0x95b   : > { %v1274_v27 = vpop.permute.xlu2 %1273 }
 0x963   : > { %v1334_v28 = vpop.permute.xlu2 %1333 }
 0x964   : > { %v1339_v33 = vsel %vm723_vm5, %v1334_v28, 0 }
 0x973   : > { %v1218_v29 = vpop.permute.xlu1 %1217 }
 0x974   : > { %v1223_v31 = vsel %vm723_vm5, %v1218_v29, 0  ;;  %v1276_v32 = vpop.permute.xlu0 %1275 }
 0x975   : > { %v1281_v34 = vsel %vm723_vm5, %v1276_v32, 0  ;;  %1232 = vmatpush.bf16.xpose.msrb.mxu0 %v1223_v31 }
 0x976   : > { %1290 = vmatpush.bf16.xpose.msrb.mxu3 %v1281_v34 }
 0x97b   : > { %v1332_v37 = vpop.permute.xlu1 %1331 }
 0x97c   : > { %v1392_v35 = vpop.permute.xlu0 %1391  ;;  %1872 = vmatmul.msk.bf16.vlgmr.msrb.gmra.mxu0 %vm723_vm5, %v2379_v25 }
 0x97d   : > { %1348 = vmatpush.bf16.xpose.msra.mxu0 %v1339_v33  ;;  %v1397_v36 = vsel %vm723_vm5, %v1392_v35, 0  ;;  %1874 = vmatmul.msk.bf16.vlgmr.msrb.gmra.mxu3 %vm723_vm5, %v1274_v27 }
 0x97e   : > { %1406 = vmatpush.bf16.xpose.msra.mxu3 %v1397_v36 }
 0x984   : > { %v1390_v38 = vpop.permute.xlu0 %1389 }
 0x98c   : > { %1876 = vmatmul.msk.bf16.vlgmr.msra.gmra.mxu0 %vm723_vm5, %v1332_v37 }
 0x98d   : > { %1878 = vmatmul.msk.bf16.vlgmr.msra.gmra.mxu3 %vm723_vm5, %v1390_v38 }
 0x9f9   : > { %v1234_v39 = vpop.f32.mrf.mxu0 }
 0x9fa   : > { %v1238_v40 = vmul.f32 0.35355338, %v1234_v39 }
 0x9fc   : > { %v1239_v41 = vadd.f32 %v1238_v40, %v2272_v51 }
 0x9fe   : > { %v1240_v42 = vsel %vm723_vm5, %v1239_v41, -inf }
 0x9ff   : > { %1241 = vmax.xlane.f32.xlu2 %v1240_v42 }
 0xa00   : > { %v1292_v43 = vpop.f32.mrf.mxu3 }
 0xa01   : > { %v1296_v44 = vmul.f32 0.35355338, %v1292_v43  ;;  %v1236_v45 = vpop.f32.mrf.mxu0 }
 0xa03   : > { %v1297_v46 = vadd.f32 %v1296_v44, %v2272_v51 }
 0xa05   : > { %v1298_v47 = vsel %vm723_vm5, %v1297_v46, -inf }
 0xa06   : > { %1299 = vmax.xlane.f32.xlu0 %v1298_v47 }
 0xa08   : > { %v1294_v48 = vpop.f32.mrf.mxu3 }
 0xa09   : > { %v1350_v49 = vpop.f32.mrf.mxu0 }
 0xa0a   : > { %v1354_v50 = vmul.f32 0.35355338, %v1350_v49  ;;  %v1971_v49 = vld [vmem:[%s2528_s6 + $0x18] sm:$0xff] }
 0xa0b   : > { %1494 = vmatpush.bf16.msrb.mxu0 %v1971_v49 }
 0xa0c   : > { %v1355_v52 = vadd.f32 %v1354_v50, %v2272_v51  ;;  %v1970_v50 = vld [vmem:[%s2528_s6 + $0x10] sm:$0xff] }
 0xa0e   : > { %v1356_v53 = vsel %vm723_vm5, %v1355_v52, -inf }
 0xa0f   : > { %1357 = vmax.xlane.f32.xlu0 %v1356_v53  ;;  %1495 = vmatpush.bf16.msrb.mxu0 %v1970_v50 }
 0xa10   : > { %v1408_v54 = vpop.f32.mrf.mxu3 }
 0xa11   : > { %v1412_v55 = vmul.f32 0.35355338, %v1408_v54  ;;  %v1352_v56 = vpop.f32.mrf.mxu0 }
 0xa13   : > { %v1413_v57 = vadd.f32 %v1412_v55, %v2272_v51 }
 0xa15   : > { %v1414_v58 = vsel %vm723_vm5, %v1413_v57, -inf }
 0xa16   : > { %1415 = vmax.xlane.f32.xlu1 %v1414_v58 }
 0xa18   : > { %v1410_v59 = vpop.f32.mrf.mxu3 }
 0xa19   : > { %v2017_v59 = vld [vmem:[%s2529_s7 + $0x1] ss:$0 sm:$0xff] }
 0xa23   : > { %1310 = vrot.lane.b32.xlu0 %v2379_v25, %s2571_s27 }
 0xa2b   : > { %1426 = vrot.lane.b32.xlu0 %v2379_v25, %s2572_s4 }
 0xa72   : > { %v1242_v60 = vpop.xlane.xlu2 %1241 }
 0xa73   : > { %v1243_v61 = vsub.f32 %v1239_v41, %v1242_v60 }
 0xa75   : > { %v1244_v62 = vmul.f32 1.442695, %v1243_v61 }
 0xa77   : > { %2050 = vpow2.f32 %v1244_v62 }
 0xa79   : > { %v1300_v63 = vpop.xlane.xlu0 %1299 }
 0xa7a   : > { %v1301_v0 = vsub.f32 %v1297_v46, %v1300_v63 }
 0xa7c   : > { %v1302_v1 = vmul.f32 1.442695, %v1301_v0 }
 0xa7d   : > { %v2051_v2 = vpop.eup %2050 }
 0xa7e   : > { %2052 = vpow2.f32 %v1302_v1  ;;  %v1246_v51 = vsel %vm723_vm5, %v2051_v2, 0.0 }
 0xa7f   : > { %1247 = vadd.xlane.f32.xlu1 %v1246_v51 }
 0xa82   : > { %v1358_v3 = vpop.xlane.xlu0 %1357 }
 0xa83   : > { %v1359_v4 = vsub.f32 %v1355_v52, %v1358_v3 }
 0xa84   : > { %v2053_v5 = vpop.eup %2052 }
 0xa85   : > { %v1360_v6 = vmul.f32 1.442695, %v1359_v4  ;;  %v1304_v7 = vsel %vm723_vm5, %v2053_v5, 0.0 }
 0xa86   : > { %1305 = vadd.xlane.f32.xlu2 %v1304_v7 }
 0xa87   : > { %2054 = vpow2.f32 %v1360_v6 }
 0xa89   : > { %v1416_v9 = vpop.xlane.xlu1 %1415 }
 0xa8a   : > { %v1417_v10 = vsub.f32 %v1413_v57, %v1416_v9 }
 0xa8c   : > { %v1418_v11 = vmul.f32 1.442695, %v1417_v10 }
 0xa8d   : > { %v2055_v12 = vpop.eup %2054 }
 0xa8e   : > { %2056 = vpow2.f32 %v1418_v11  ;;  %v1362_v13 = vsel %vm723_vm5, %v2055_v12, 0.0 }
 0xa8f   : > { %1363 = vadd.xlane.f32.xlu1 %v1362_v13 }
 0xa94   : > { %v2057_v14 = vpop.eup %2056 }
 0xa95   : > { %v1311_v15 = vpop.permute.xlu0 %1310  ;;  %v1420_v17 = vsel %vm723_vm5, %v2057_v14, 0.0 }
 0xa96   : > { %v1316_v16 = vsel %vm765_vm7, %v1311_v15, 0 }
 0xa97   : > { %1421 = vadd.xlane.f32.xlu1 %v1420_v17  ;;  %1325 = vmatpush.bf16.msra.mxu2 %v1316_v16  ;;  %v2018_v16 = vld [vmem:[%s2530_s8 + $0x1] ss:$0 sm:$0xff] }
 0xa9d   : > { %v1427_v18 = vpop.permute.xlu0 %1426 }
 0xa9e   : > { %1252 = vrot.lane.b32.xlu2 %v2379_v25, %s2573_s29  ;;  %v1432_v19 = vsel %vm765_vm7, %v1427_v18, 0  ;;  %v2019_v18 = vld [vmem:[%s2531_s9 + $0x1] ss:$0 sm:$0xff] }
 0xa9f   : > { %1441 = vmatpush.bf16.msrb.mxu2 %v1432_v19 }
 0xab0   : > { %1368 = vrot.lane.b32.xlu1 %v2379_v25, %s2574_s23  ;;  %s636_s23 = scalar_lea.vmem %s2542_s20, %s2579_s22 }
 0xaf2   : > { %v1248_v20 = vpop.xlane.xlu1 %1247 }
 0xaf3   : > { %2058 = vrcp.f32 %v1248_v20 }
 0xaf9   : > { %v1306_v21 = vpop.xlane.xlu2 %1305  ;;  %v2059_v22 = vpop.eup %2058 }
 0xafa   : > { %2060 = vrcp.f32 %v1306_v21  ;;  %v1250_v24 = vmul.f32 %v2059_v22, %v2051_v2 }
 0xafc   : > { %v1251_v32 = vpack.c.bf16 %v1250_v24, %v1250_v24  ;;  %v1976_v24 = vld [vmem:[%s2534_s12 + $0x30] sm:$0xff] }
 0xb00   : > { %v2061_v23 = vpop.eup %2060 }
 0xb01   : > { %v1308_v26 = vmul.f32 %v2061_v23, %v2053_v5  ;;  %v1253_v27 = vpop.permute.xlu2 %1252  ;;  %v1973_v5 = vld [vmem:[%s2532_s10 + $0x18] sm:$0xff] }
 0xb02   : > { %v1258_v28 = vsel %vm765_vm7, %v1253_v27, 0  ;;  %v1364_v29 = vpop.xlane.xlu1 %1363  ;;  %v1977_v23 = vld [vmem:[%s2534_s12 + $0x38] sm:$0xff]  ;;  %v1974_v27 = vld [vmem:[%s2534_s12 + $0x20] sm:$0xff] }
 0xb03   : > { %v1309_v31 = vpack.c.bf16 %v1308_v26, %v1308_v26  ;;  %1267 = vmatpush.bf16.msrb.mxu1 %v1258_v28  ;;  %1630 = vmatpush.bf16.msrb.mxu3 %v1977_v23  ;;  %v1975_v26 = vld [vmem:[%s2534_s12 + $0x28] sm:$0xff]  ;;  %v2020_v28 = vld [vmem:[%s2533_s11 + $0x1] ss:$0 sm:$0xff] }
 0xb05   : > { %1875 = vmatmul.msk.bf16.vlgmr.msra.gmra.mxu2 %vm723_vm5, %v1309_v31 }
 0xb06   : > { %1873 = vmatmul.msk.bf16.vlgmr.msrb.gmra.mxu1 %vm723_vm5, %v1251_v32 }
 0xb07   : > { %1631 = vmatpush.bf16.msrb.mxu3 %v1976_v24 }
 0xb0a   : > { %v1422_v25 = vpop.xlane.xlu1 %1421 }
 0xb0b   : > { %2062 = vrcp.f32 %v1422_v25  ;;  %1632 = vmatpush.bf16.msrb.mxu3 %v1975_v26 }
 0xb0c   : > { %2064 = vrcp.f32 %v1364_v29 }
 0xb0f   : > { %1633 = vmatpush.bf16.msrb.mxu3 %v1974_v27 }
 0xb11   : > { %v2063_v33 = vpop.eup %2062 }
 0xb12   : > { %v1424_v34 = vmul.f32 %v2063_v33, %v2057_v14  ;;  %v2065_v36 = vpop.eup %2064 }
 0xb13   : > { %v1366_v37 = vmul.f32 %v2065_v36, %v2055_v12 }
 0xb14   : > { %v1425_v35 = vpack.c.bf16 %v1424_v34, %v1424_v34 }
 0xb15   : > { %v1367_v40 = vpack.c.bf16 %v1366_v37, %v1366_v37 }
 0xb16   : > { %1879 = vmatmul.msk.bf16.vlgmr.msrb.gmra.mxu2 %vm723_vm5, %v1425_v35 }
 0xb22   : > { %v1369_v38 = vpop.permute.xlu1 %1368 }
 0xb23   : > { %v1374_v39 = vsel %vm765_vm7, %v1369_v38, 0 }
 0xb24   : > { %1383 = vmatpush.bf16.msra.mxu1 %v1374_v39 }
 0xb27   : > { %1877 = vmatmul.msk.bf16.vlgmr.msra.gmra.mxu1 %vm723_vm5, %v1367_v40 }
 0xb28   : > { %1568 = vmatpush.bf16.msrb.mxu1 %v1973_v5 }
 0xb83   : > { %v1269_v41 = vpop.f32.mrf.mxu1 }
 0xb88   : > { %v1327_v42 = vpop.f32.mrf.mxu2 }
 0xb89   : > { %1448 = vrot.lane.b32.xlu2 %v1327_v42, %s2575_s24  ;;  %v2021_v42 = vld [vmem:[%s2535_s13 + $0x1] ss:$0 sm:$0xff] }
 0xb8b   : > { %v1271_v43 = vpop.f32.mrf.mxu1 }
 0xb90   : > { %v1329_v44 = vpop.f32.mrf.mxu2 }
 0xb99   : > { %v1443_v45 = vpop.f32.mrf.mxu2 }
 0xb9a   : > { %1456 = vrot.lane.b32.xlu2 %v1443_v45, %s2576_s21 }
 0xba1   : > { %v1445_v46 = vpop.f32.mrf.mxu2 }
 0xba4   : > { %v1385_v47 = vpop.f32.mrf.mxu1 }
 0xba5   : > { %1452 = vrot.lane.b32.xlu0 %v1385_v47, %s2577_s30 }
 0xbac   : > { %v1387_v48 = vpop.f32.mrf.mxu1 }
 0xbe3   : > { %v1449_v52 = vpop.permute.xlu2 %1448 }
 0xbe4   : > { %v1459_v53 = vsel %vm723_vm5, %v1269_v41, %v1449_v52 }
 0xbf4   : > { %v1457_v55 = vpop.permute.xlu2 %1456 }
 0xc17   : > { %v1453_v54 = vpop.permute.xlu0 %1452 }
 0xc18   : > { %v1460_v56 = vsel %vm969_vm8, %v1459_v53, %v1453_v54  ;;  %v1979_v54 = vld [vmem:[%s2538_s16 + $0x8] sm:$0xff] }
 0xc19   : > { %v1461_v57 = vsel %vm971_vm9, %v1460_v56, %v1457_v55  ;;  %1701 = vmatpush.bf16.msra.mxu2 %v1979_v54  ;;  %v1978_v55 = vld [vmem:[%s2538_s16] sm:$0xff] }
 0xc1a   : > { %v1462_v58 = vpack.c.bf16 %v1461_v57, %v1461_v57 }
 0xc1c   : > { %1893 = vmatmul.msk.bf16.vlgmr.msrb.gmra.mxu0 %vm644_vm0, %v1462_v58 }
 0xc1d   : > { %1702 = vmatpush.bf16.msra.mxu2 %v1978_v55 }
 0xc99   : > { %v1497_v60 = vpop.f32.mrf.mxu0 }
 0xc9a   : > { %v1498_v61 = vadd.f32 %v2017_v59, %v1497_v60 }
 0xc9c   : > { %v1501_v62 = vadd.f32 %v1498_v61, %v2371_v30  ;;  %v1972_v30 = vld [vmem:[%s2532_s10 + $0x10] sm:$0xff] }
 0xc9d   : > { %1569 = vmatpush.bf16.msrb.mxu1 %v1972_v30  ;;  %v1981_v30 = vld [vmem:[%s2540_s18 + $0x8] sm:$0xff] }
 0xc9e   : > { %v1506_v63 = vsel %vm644_vm0, %v1501_v62, 0.0  ;;  %1736 = vmatpush.bf16.msra.mxu0 %v1981_v30 }
 0xc9f   : > { %1507 = vadd.xlane.f32.xlu0 %v1506_v63 }
 0xca1   : > { %v1499_v0 = vpop.f32.mrf.mxu0 }
 0xd12   : > { %v1508_v1 = vpop.xlane.xlu0 %1507 }
 0xd13   : > { %v1509_v2 = vmul.f32 %v1508_v1, %v2218_v8  ;;  %v2022_v1 = vld [vmem:[%s2536_s14 + $0x1] ss:$0 sm:$0xff] }
 0xd15   : > { %v1510_v51 = vsub.f32 %v1501_v62, %v1509_v2 }
 0xd17   : > { %v1511_v3 = vmul.f32 %v1510_v51, %v1510_v51 }
 0xd19   : > { %v1512_v4 = vsel %vm644_vm0, %v1511_v3, 0.0 }
 0xd1a   : > { %1513 = vadd.xlane.f32.xlu2 %v1512_v4 }
 0xd8d   : > { %v1514_v6 = vpop.xlane.xlu2 %1513 }
 0xd8e   : > { %v1515_v7 = vmul.f32 %v1514_v6, %v2218_v8  ;;  %v1980_v6 = vld [vmem:[%s2540_s18] sm:$0xff] }
 0xd8f   : > { %1737 = vmatpush.bf16.msra.mxu0 %v1980_v6 }
 0xd90   : > { %v1516_v9 = vadd.f32 1e-12, %v1515_v7  ;;  %v1679_v7 = vld [vmem:[%s2539_s17] sm:$0x1] }
 0xd92   : > { %2066 = vrsqrt.f32 %v1516_v9  ;;  %vm1523_vm3 = vweird.f32 %v1516_v9 }
 0xd98   : > { %v2067_v10 = vpop.eup %2066 }
 0xd99   : > { %v1518_v11 = vmul.f32 %v2067_v10, %v1516_v9  ;;  %vm1524_vm2 = vweird.f32 %v2067_v10 }
 0xd9a   : > { %vm1525_vm4 = vmor %vm1523_vm3, %vm1524_vm2 }
 0xd9b   : > { %v1519_v12 = vmul.f32 %v2067_v10, %v1518_v11 }
 0xd9d   : > { %v1520_v13 = vmul.f32 0.5, %v1519_v12 }
 0xd9f   : > { %v1521_v14 = vsub.f32 1.5, %v1520_v13 }
 0xda1   : > { %v1522_v15 = vmul.f32 %v2067_v10, %v1521_v14  ;;  %v1714_v14 = vld [vmem:[%s2541_s19] sm:$0x1] }
 0xda3   : > { %v1526_v17 = vsel %vm1525_vm4, %v2067_v10, %v1522_v15 }
 0xda4   : > { %v1527_v19 = vmul.f32 %v1526_v17, %v1510_v51 }
 0xda6   : > { %v1531_v20 = vmul.f32 %v2018_v16, %v1527_v19 }
 0xda8   : > { %v1535_v21 = vadd.f32 %v2019_v18, %v1531_v20 }
 0xdaa   : > { %v1536_v22 = vpack.c.bf16 %v1535_v21, %v1535_v21 }
 0xdac   : > { %1909 = vmatmul.msk.bf16.vlgmr.msrb.gmra.mxu1 %vm644_vm0, %v1536_v22 }
 0xe29   : > { %v1571_v29 = vpop.f32.mrf.mxu1 }
 0xe2a   : > { %v1572_v31 = vadd.f32 %v2020_v28, %v1571_v29 }
 0xe2c   : > { %v1576_v32 = vmul.f32 0.044715, %v1572_v31  ;;  %v1575_v38 = vmul.f32 0.5, %v1572_v31 }
 0xe2e   : > { %v1577_v25 = vmul.f32 %v1576_v32, %v1572_v31 }
 0xe30   : > { %v1578_v33 = vmul.f32 %v1577_v25, %v1572_v31 }
 0xe31   : > { %v1573_v34 = vpop.f32.mrf.mxu1 }
 0xe32   : > { %v1579_v35 = vadd.f32 %v1578_v33, %v1572_v31 }
 0xe34   : > { %v1580_v36 = vmul.f32 0.7978846, %v1579_v35 }
 0xe36   : > { %2068 = vtanh.f32 %v1580_v36 }
 0xe3c   : > { %v2069_v37 = vpop.eup %2068 }
 0xe3d   : > { %v1582_v39 = vadd.f32 1.0, %v2069_v37 }
 0xe3f   : > { %v1583_v40 = vmul.f32 %v1582_v39, %v1575_v38 }
 0xe41   : > { %v1584_v41 = vpack.c.bf16 %v1583_v40, %v1583_v40 }
 0xe43   : > { %1935 = vmatmul.msk.bf16.vlgmr.msrb.gmra.mxu3 %vm1126_vm13, %v1584_v41 }
 0xec6   : > { %v1635_v43 = vpop.f32.mrf.mxu3 }
 0xec7   : > { %v1636_v44 = vadd.f32 %v2021_v42, %v1635_v43 }
 0xec9   : > { %v1639_v45 = vadd.f32 %v1636_v44, %v1535_v21 }
 0xecb   : > { %v1644_v46 = vsel %vm644_vm0, %v1639_v45, 0.0 }
 0xecc   : > { %1645 = vadd.xlane.f32.xlu1 %v1644_v46 }
 0xece   : > { %v1637_v47 = vpop.f32.mrf.mxu3 }
 0xf3f   : > { %v1646_v48 = vpop.xlane.xlu1 %1645 }
 0xf40   : > { %v1647_v49 = vmul.f32 %v1646_v48, %v2218_v8 }
 0xf42   : > { %v1648_v50 = vsub.f32 %v1639_v45, %v1647_v49 }
 0xf44   : > { %v1649_v52 = vmul.f32 %v1648_v50, %v1648_v50 }
 0xf46   : > { %v1650_v53 = vsel %vm644_vm0, %v1649_v52, 0.0 }
 0xf47   : > { %1651 = vadd.xlane.f32.xlu0 %v1650_v53 }
 0xfba   : > { %v1652_v56 = vpop.xlane.xlu0 %1651 }
 0xfbb   : > { %v1653_v57 = vmul.f32 %v1652_v56, %v2218_v8  ;;  %v2023_v8 = vld [vmem:[%s2537_s15 + $0x1] ss:$0 sm:$0xff] }
 0xfbd   : > { %v1654_v58 = vadd.f32 1e-12, %v1653_v57 }
 0xfbf   : > { %2070 = vrsqrt.f32 %v1654_v58  ;;  %vm1661_vm6 = vweird.f32 %v1654_v58 }
 0xfc5   : > { %v2071_v59 = vpop.eup %2070 }
 0xfc6   : > { %v1656_v60 = vmul.f32 %v2071_v59, %v1654_v58  ;;  %vm1662_vm5 = vweird.f32 %v2071_v59 }
 0xfc7   : > { %vm1663_vm7 = vmor %vm1661_vm6, %vm1662_vm5 }
 0xfc8   : > { %v1657_v61 = vmul.f32 %v2071_v59, %v1656_v60 }
 0xfca   : > { %v1658_v62 = vmul.f32 0.5, %v1657_v61 }
 0xfcc   : > { %v1659_v63 = vsub.f32 1.5, %v1658_v62 }
 0xfce   : > { %v1660_v0 = vmul.f32 %v2071_v59, %v1659_v63 }
 0xfd0   : > { %v1664_v2 = vsel %vm1663_vm7, %v2071_v59, %v1660_v0 }
 0xfd1   : > { %v1665_v51 = vmul.f32 %v1664_v2, %v1648_v50 }
 0xfd3   : > { %v1669_v3 = vmul.f32 %v2022_v1, %v1665_v51 }
 0xfd5   : > { %v1673_v4 = vadd.f32 %v2023_v8, %v1669_v3 }
 0xfd7   : > { %v1674_v5 = vpack.c.bf16 %v1673_v4, %v1673_v4 }
 0xfd9   : > { %1946 = vmatmul.msk.bf16.vlgmr.msra.gmra.mxu2 %vm644_vm0, %v1674_v5 }
0x105c   : > { %v1704_v9 = vpop.f32.mrf.mxu2 }
0x105d   : > { %v1705_v10 = vadd.f32 %v1704_v9, %v1679_v7 }
0x105f   : > { %2072 = vtanh.f32 %v1705_v10 }
0x1064   : > { %v1706_v11 = vpop.f32.mrf.mxu2 }
0x1065   : > { %v2073_v12 = vpop.eup %2072 }
0x1066   : > { %v1709_v13 = vpack.c.bf16 %v2073_v12, %v2073_v12 }
0x1068   : > { %1955 = vmatmul.msk.bf16.vlgmr.msra.gmra.mxu0 %vm644_vm0, %v1709_v13 }
0x10e5   : > { %v1739_v15 = vpop.f32.mrf.mxu0 }
0x10e6   : > { %v1740_v16 = vadd.f32 %v1739_v15, %v1714_v14 }
0x10e8   : > { %1743 = vst [vmem:[%s636_s23] sm:$0x1] %v1740_v16 }
0x10ed   : > { %v1741_v17 = vpop.f32.mrf.mxu0 }
0x10ee PF: > { %s30_s1 = sadd.s32 1, %s2080_s1  }
0x10ef   : > { %p27_p4 = scmp.ge.s32.totalorder %s30_s1, 4  }
0x10f1   :  { %29 = sbr.rel (!%p27_p4) target bundleno = 6 (0x6), region = 145 }

</bundles_post_ra>
